<compile_context>
chip_gen: v6e
topology: v6e:2x2x1
jax: 0.10.0
libtpu: 0.0.40
codegen_flags: <defaults>
</compile_context>

<pallas_src>
import jax
import jax.numpy as jnp
from jax.experimental import pallas as pl
from jax.experimental.pallas import tpu as pltpu


def _fullycon_deep_kernel(x_ref, w1_ref, b1_ref, w2_ref, b2_ref, o_ref):
    # x_ref:  (1, D_in)     bf16
    # w1_ref: (D_in, D_out) bf16   b1_ref: (1, D_out) f32
    # w2_ref: (D_out, D_out) bf16  b2_ref: (1, D_out) f32
    # o_ref:  (1, D_out)    f32
    h = jnp.dot(x_ref[...], w1_ref[...], preferred_element_type=jnp.float32)
    h = h + b1_ref[...]
    # F.leaky_relu default negative_slope = 0.01 -- keep elementwise math in f32.
    h = jnp.where(h > 0, h, 0.01 * h)
    # Only the MXU operand is cast to bf16; accumulation stays f32.
    z = jnp.dot(h.astype(jnp.bfloat16), w2_ref[...], preferred_element_type=jnp.float32)
    z = z + b2_ref[...]
    o_ref[...] = z.astype(o_ref.dtype)


def fullycon_deep_forward(x, w1, b1, w2, b2, out_hw):
    """x: (1, 10, H_in, W_in) float32 (NCHW).  Returns (1, 10, H_out, W_out) float32."""
    h_out, w_out = out_hw
    d_in, d_out = w1.shape

    # x.view(-1): flatten in (N, C, H, W) order, then treat as a (1, D_in) row.
    x_flat = x.reshape(1, d_in).astype(jnp.bfloat16)
    w1_b = w1.astype(jnp.bfloat16)
    w2_b = w2.astype(jnp.bfloat16)
    b1_row = b1.reshape(1, d_out).astype(jnp.float32)
    b2_row = b2.reshape(1, d_out).astype(jnp.float32)

    # Whole-array-in-VMEM specs: no grid, no auto-pipeline double-buffering.
    vmem = pl.BlockSpec(memory_space=pltpu.MemorySpace.VMEM)

    out = pl.pallas_call(
        _fullycon_deep_kernel,
        out_shape=jax.ShapeDtypeStruct((1, d_out), jnp.float32),
        in_specs=[vmem, vmem, vmem, vmem, vmem],
        out_specs=vmem,
    )(x_flat, w1_b, b1_row, w2_b, b2_row)

    # torch.reshape(x, (1, 10, out_dim[0], out_dim[1]))
    return out.reshape(1, 10, h_out, w_out)


def _init_linear(key, fan_in, fan_out):
    # Deterministic stand-in for nn.Linear init: U(-1/sqrt(fan_in), +1/sqrt(fan_in)).
    k_w, k_b = jax.random.split(key)
    bound = 1.0 / jnp.sqrt(jnp.float32(fan_in))
    # Stored as (fan_in, fan_out) so the kernel does x @ W (PyTorch stores (out, in)).
    w = jax.random.uniform(k_w, (fan_in, fan_out), jnp.float32, -bound, bound)
    b = jax.random.uniform(k_b, (fan_out,), jnp.float32, -bound, bound)
    return w, b


if __name__ == "__main__":
    # Small synthetic "task": input grid 8x8, output grid 8x8 (10 channels each).
    H_IN, W_IN = 8, 8
    H_OUT, W_OUT = 8, 8
    D_IN = H_IN * W_IN * 10     # 640 (lane-friendly: 5 * 128)
    D_OUT = H_OUT * W_OUT * 10  # 640

    key = jax.random.PRNGKey(0)
    k_x, k_l1, k_l2 = jax.random.split(key, 3)

    # Input corresponds to a one-hot-ish (1, 10, H, W) grid encoding; here random.
    x = jax.random.normal(k_x, (1, 10, H_IN, W_IN), jnp.float32)

    w1, b1 = _init_linear(k_l1, D_IN, D_OUT)
    w2, b2 = _init_linear(k_l2, D_IN, D_OUT)

    out = fullycon_deep_forward(x, w1, b1, w2, b2, (H_OUT, W_OUT))
    out = jax.block_until_ready(out)

    # Pure-JAX reference using the same bf16 operand casts / f32 accumulation.
    x_flat = x.reshape(1, D_IN).astype(jnp.bfloat16)
    h_ref = jnp.dot(x_flat, w1.astype(jnp.bfloat16),
                    preferred_element_type=jnp.float32) + b1
    h_ref = jnp.where(h_ref > 0, h_ref, 0.01 * h_ref)
    z_ref = jnp.dot(h_ref.astype(jnp.bfloat16), w2.astype(jnp.bfloat16),
                    preferred_element_type=jnp.float32) + b2
    z_ref = z_ref.reshape(1, 10, H_OUT, W_OUT)

    assert out.shape == (1, 10, H_OUT, W_OUT)
    assert jnp.allclose(out, z_ref, atol=1e-2, rtol=1e-2), (
        float(jnp.max(jnp.abs(out - z_ref))))

    print("KERNEL_OK")
</pallas_src>

<mosaic_0001>
module attributes {stable_mosaic.version = 11 : i64} {
  func.func @_fullycon_deep_kernel(%arg0: memref<1x640xbf16, #tpu.memory_space<vmem>>, %arg1: memref<640x640xbf16, #tpu.memory_space<vmem>>, %arg2: memref<1x640xf32, #tpu.memory_space<vmem>>, %arg3: memref<640x640xbf16, #tpu.memory_space<vmem>>, %arg4: memref<1x640xf32, #tpu.memory_space<vmem>>, %arg5: memref<1x640xf32, #tpu.memory_space<vmem>>) attributes {dimension_semantics = [], scalar_prefetch = 0 : i64, scratch_operands = 0 : i64, tpu.core_type = #tpu.core_type<tc>} {
    %c0 = arith.constant 0 : index
    %c0_0 = arith.constant 0 : index
    %0 = vector.load %arg0[%c0, %c0_0] : memref<1x640xbf16, #tpu.memory_space<vmem>>, vector<1x640xbf16>
    %c0_1 = arith.constant 0 : index
    %c0_2 = arith.constant 0 : index
    %1 = vector.load %arg1[%c0_1, %c0_2] : memref<640x640xbf16, #tpu.memory_space<vmem>>, vector<640x640xbf16>
    %cst = arith.constant dense<0.000000e+00> : vector<1x640xf32>
    %2 = tpu.matmul %0, %1, %cst {dimension_numbers = #tpu.dot_dimension_numbers<[1], [0], [0], [1], [0, 0, 1, 1], [], []>} : vector<1x640xbf16>, vector<640x640xbf16>, vector<1x640xf32> -> vector<1x640xf32>
    %c0_3 = arith.constant 0 : index
    %c0_4 = arith.constant 0 : index
    %3 = vector.load %arg2[%c0_3, %c0_4] : memref<1x640xf32, #tpu.memory_space<vmem>>, vector<1x640xf32>
    %4 = arith.addf %2, %3 : vector<1x640xf32>
    %cst_5 = arith.constant 0.000000e+00 : f32
    %5 = vector.broadcast %cst_5 : f32 to vector<1x640xf32>
    %6 = arith.cmpf ogt, %4, %5 : vector<1x640xf32>
    %cst_6 = arith.constant 0.00999999977 : f32
    %7 = vector.broadcast %cst_6 : f32 to vector<1x640xf32>
    %8 = arith.mulf %7, %4 : vector<1x640xf32>
    %9 = arith.select %6, %4, %8 : vector<1x640xi1>, vector<1x640xf32>
    %10 = arith.truncf %9 : vector<1x640xf32> to vector<1x640xbf16>
    %c0_7 = arith.constant 0 : index
    %c0_8 = arith.constant 0 : index
    %11 = vector.load %arg3[%c0_7, %c0_8] : memref<640x640xbf16, #tpu.memory_space<vmem>>, vector<640x640xbf16>
    %cst_9 = arith.constant dense<0.000000e+00> : vector<1x640xf32>
    %12 = tpu.matmul %10, %11, %cst_9 {dimension_numbers = #tpu.dot_dimension_numbers<[1], [0], [0], [1], [0, 0, 1, 1], [], []>} : vector<1x640xbf16>, vector<640x640xbf16>, vector<1x640xf32> -> vector<1x640xf32>
    %c0_10 = arith.constant 0 : index
    %c0_11 = arith.constant 0 : index
    %13 = vector.load %arg4[%c0_10, %c0_11] : memref<1x640xf32, #tpu.memory_space<vmem>>, vector<1x640xf32>
    %14 = arith.addf %12, %13 : vector<1x640xf32>
    %c0_12 = arith.constant 0 : index
    %c0_13 = arith.constant 0 : index
    %15 = vector.load %arg5[%c0_12, %c0_13] : memref<1x640xf32, #tpu.memory_space<vmem>>, vector<1x640xf32>
    tpu.vector_store %arg5[%c0_12, %c0_13], %14 {strides = array<i32>} : memref<1x640xf32, #tpu.memory_space<vmem>>, vector<1x640xf32>,
    return
  }
}

</mosaic_0001>

<bundles_post_ra>
// kernel: tpu_custom_call.1
= control target key start
LH: loop header
LB: loop body
LE: loop exit
PB: predicated region body
PF: predicated region fallthrough
CT: control target
= control target key end

     0   :  { %10 = vsyncpa [#allocation3], 0  ;;  %s4975_s0 = inlined_call_operand.hbm [shape: bf16[1,640], index: 0, kind: input, shape index: {}]   ;;  %s4976_s1 = inlined_call_operand.hbm [shape: bf16[640,640], index: 1, kind: input, shape index: {}]   ;;  %s4977_s2 = inlined_call_operand.hbm [shape: f32[1,640], index: 2, kind: input, shape index: {}]   ;;  %s4978_s3 = inlined_call_operand.hbm [shape: bf16[640,640], index: 3, kind: input, shape index: {}]   ;;  %s4979_s4 = inlined_call_operand.vmem [shape: f32[1,640], index: 4, kind: input, shape index: {}]   ;;  %s4980_s5 = inlined_call_operand.hbm [shape: f32[1,640], index: 5, kind: output, shape index: {}]  }
   0x1   :  { %11 = vsyncpa [#allocation6], 0 }
   0x2   :  { %12 = vsyncpa [#allocation9], 0 }
   0x3   :  { %13 = vsyncpa [#allocation4], 0  ;;  %s4778_s18 = smov [#allocation5]  }
   0x4   :  { %s29_s19 = sshll.u32 %s4778_s18, 4  ;;  %s30_s19 = int_to_ptr.vmem [resolvable:$true] %s29_s19 }
   0x5   :  { %s4678_s20 = scalar_lea.vmem %s30_s19, 25600  ;;  %p4683_p1 = scmp.lt.s32.totalorder %s30_s19, %s30_s19 }
   0x6   :  { %p4679_p0 = scmp.ne.s32.totalorder %s30_s19, %s4678_s20  ;;  %p4684_p2 = scmp.lt.s32.totalorder %s4678_s20, %s4678_s20 }
   0x8   :  { %p4685_p3 = por %p4684_p2, %p4683_p1 }
   0xa   :  { %p4686_p4 = pnand %p4685_p3, %p4679_p0 }
   0xc   :  { %4689 = shalt.err (!%p4686_p4)
}
   0xd   :  { %s4779_s21 = smov 320   ;;  %s4780_s22 = smov 20  }
   0xe   :  { %35 = dma.hbm_to_vmem [thread:$0]  %s4976_s1, 25600, %s30_s19, [#allocation6], %s4779_s21, %s4779_s21, %s4780_s22  }
   0xf   :  { %s4781_s25 = smov [#allocation2]   ;;  %s4782_s27 = smov [#allocation7]  }
  0x10   :  { %s20_s26 = sshll.u32 %s4781_s25, 4  ;;  %s42_s28 = sshll.u32 %s4782_s27, 4  ;;  %s21_s26 = int_to_ptr.vmem [resolvable:$true] %s20_s26  ;;  %s43_s28 = int_to_ptr.vmem [resolvable:$true] %s42_s28 }
  0x11   :  { %s4698_s29 = scalar_lea.vmem %s21_s26, 80  ;;  %s4702_s30 = scalar_lea.vmem %s21_s26, 96 }
  0x12   :  { %p4699_p5 = scmp.ne.s32.totalorder %s21_s26, %s4698_s29  ;;  %p4703_p6 = scmp.lt.s32.totalorder %s21_s26, %s21_s26 }
  0x13   :  { %p4704_p7 = scmp.lt.s32.totalorder %s4702_s30, %s4698_s29 }
  0x15   :  { %p4705_p8 = por %p4704_p7, %p4703_p6 }
  0x17   :  { %p4706_p9 = pnand %p4705_p8, %p4699_p5 }
  0x19   :  { %4709 = shalt.err (!%p4706_p9)
}
  0x1a   :  { %23 = dma.hbm_to_vmem [thread:$0]  %s4975_s0, 80, %s21_s26, [#allocation3]  }
  0x1b   :  { %s4718_s8 = scalar_lea.vmem %s43_s28, 80  ;;  %s4722_s1 = scalar_lea.vmem %s43_s28, 96 }
  0x1c   :  { %p4719_p10 = scmp.ne.s32.totalorder %s43_s28, %s4718_s8  ;;  %p4723_p11 = scmp.lt.s32.totalorder %s43_s28, %s43_s28 }
  0x1d   :  { %p4724_p12 = scmp.lt.s32.totalorder %s4722_s1, %s4718_s8 }
  0x1f   :  { %p4725_p13 = por %p4724_p12, %p4723_p11 }
  0x21   :  { %p4726_p0 = pnand %p4725_p13, %p4719_p10 }
  0x23   :  { %4729 = shalt.err (!%p4726_p0)
}
  0x24   :  { %45 = dma.hbm_to_vmem [thread:$0]  %s4977_s2, 80, %s43_s28, [#allocation6]  }
  0x25   :  { %s4783_s11 = smov [#allocation8]  }
  0x26   :  { %s51_s12 = sshll.u32 %s4783_s11, 4  ;;  %s52_s12 = int_to_ptr.vmem [resolvable:$true] %s51_s12 }
  0x27   :  { %s4738_s13 = scalar_lea.vmem %s52_s12, 25600  ;;  %p4743_p2 = scmp.lt.s32.totalorder %s52_s12, %s52_s12 }
  0x28   :  { %p4739_p1 = scmp.ne.s32.totalorder %s52_s12, %s4738_s13  ;;  %p4744_p3 = scmp.lt.s32.totalorder %s4738_s13, %s4738_s13 }
  0x2a   :  { %p4745_p4 = por %p4744_p3, %p4743_p2 }
  0x2c   :  { %p4746_p5 = pnand %p4745_p4, %p4739_p1 }
  0x2e   :  { %4749 = shalt.err (!%p4746_p5)
}
  0x2f   :  { %57 = dma.hbm_to_vmem [thread:$0]  %s4978_s3, 25600, %s52_s12, [#allocation9], %s4779_s21, %s4779_s21, %s4780_s22  }
  0x30   :  { %4770 = dma.done.wait [#allocation3], 80  }
  0x31   :  { %4771 = vsyncadd [#allocation3], 4294967216 }
  0x32   :  { %4772 = dma.done.wait [#allocation6], 25680  }
  0x33   :  { %4773 = vsyncadd [#allocation6], 4294941616 }
  0x34   :  { %4774 = dma.done.wait [#allocation9], 25600  }
  0x35   :  { %4775 = vsyncadd [#allocation9], 4294941696  ;;  %v4109_v0 = vld [vmem:[#allocation5 + $0x11c] ss:$20 sps:$4 sm:$0xff]   ;;  %v4111_v1 = vld [vmem:[#allocation5 + $0x118] ss:$20 sps:$4 sm:$0xff]   ;;  %v320_v37 = vlaneseq }
  0x36   :  { %1426 = vmatprep.subr.bf16.mxu0 %v4109_v0  ;;  %v4112_v2 = vld [vmem:[#allocation5 + $0x39c] ss:$20 sps:$4 sm:$0xff]   ;;  %v4114_v3 = vld [vmem:[#allocation5 + $0x398] ss:$20 sps:$4 sm:$0xff]   ;;  %v4115_v4 = vld [vmem:[#allocation5 + $0xf4] ss:$20 sps:$4 sm:$0xff]  }
  0x37   :  { %1427 = vmatpush1.bf16.msra.mxu0 %v4111_v1  ;;  %v4117_v5 = vld [vmem:[#allocation5 + $0xf0] ss:$20 sps:$4 sm:$0xff]   ;;  %1467 = vmatprep.subr.bf16.mxu1 %v4112_v2  ;;  %v4118_v6 = vld [vmem:[#allocation5 + $0x374] ss:$20 sps:$4 sm:$0xff]   ;;  %v4121_v8 = vld [vmem:[#allocation5 + $0xcc] ss:$20 sps:$4 sm:$0xff]  }
  0x38   :  { %1468 = vmatpush1.bf16.msra.mxu1 %v4114_v3  ;;  %1428 = vmatprep.subr.bf16.mxu0 %v4115_v4  ;;  %v4120_v7 = vld [vmem:[#allocation5 + $0x370] ss:$20 sps:$4 sm:$0xff]   ;;  %v4123_v9 = vld [vmem:[#allocation5 + $0xc8] ss:$20 sps:$4 sm:$0xff]   ;;  %v4124_v10 = vld [vmem:[#allocation5 + $0x34c] ss:$20 sps:$4 sm:$0xff]  }
  0x39   :  { %1469 = vmatprep.subr.bf16.mxu1 %v4118_v6  ;;  %v4127_v11 = vld [vmem:[#allocation5 + $0xa4] ss:$20 sps:$4 sm:$0xff]   ;;  %v4126_v12 = vld [vmem:[#allocation5 + $0x348] ss:$20 sps:$4 sm:$0xff]   ;;  %v4129_v14 = vld [vmem:[#allocation5 + $0xa0] ss:$20 sps:$4 sm:$0xff]  }
  0x3a   :  { %v4130_v13 = vld [vmem:[#allocation5 + $0x324] ss:$20 sps:$4 sm:$0xff]   ;;  %v4133_v15 = vld [vmem:[#allocation5 + $0x7c] ss:$20 sps:$4 sm:$0xff]   ;;  %v4132_v16 = vld [vmem:[#allocation5 + $0x320] ss:$20 sps:$4 sm:$0xff]  }
  0x3b   :  { %1429 = vmatpush1.bf16.msra.mxu0 %v4117_v5  ;;  %v4136_v17 = vld [vmem:[#allocation5 + $0x2fc] ss:$20 sps:$4 sm:$0xff]   ;;  %v4135_v18 = vld [vmem:[#allocation5 + $0x78] ss:$20 sps:$4 sm:$0xff]   ;;  %v4139_v19 = vld [vmem:[#allocation5 + $0x54] ss:$20 sps:$4 sm:$0xff]  }
  0x3c   :  { %1430 = vmatprep.subr.bf16.mxu0 %v4121_v8  ;;  %1470 = vmatpush1.bf16.msra.mxu1 %v4120_v7  ;;  %v4138_v20 = vld [vmem:[#allocation5 + $0x2f8] ss:$20 sps:$4 sm:$0xff]   ;;  %v4142_v21 = vld [vmem:[#allocation5 + $0x2d4] ss:$20 sps:$4 sm:$0xff]   ;;  %v4141_v22 = vld [vmem:[#allocation5 + $0x50] ss:$20 sps:$4 sm:$0xff]  }
  0x3d   :  { %1471 = vmatprep.subr.bf16.mxu1 %v4124_v10  ;;  %v4145_v23 = vld [vmem:[#allocation5 + $0x2c] ss:$20 sps:$4 sm:$0xff]   ;;  %v4144_v24 = vld [vmem:[#allocation5 + $0x2d0] ss:$20 sps:$4 sm:$0xff]   ;;  %v4147_v26 = vld [vmem:[#allocation5 + $0x28] ss:$20 sps:$4 sm:$0xff]  }
  0x3e   :  { %v4148_v25 = vld [vmem:[#allocation5 + $0x2ac] ss:$20 sps:$4 sm:$0xff]   ;;  %v4151_v27 = vld [vmem:[#allocation5 + $0x4] ss:$20 sps:$4 sm:$0xff]   ;;  %v4150_v28 = vld [vmem:[#allocation5 + $0x2a8] ss:$20 sps:$4 sm:$0xff]  }
  0x3f   :  { %1431 = vmatpush1.bf16.msra.mxu0 %v4123_v9  ;;  %v4154_v29 = vld [vmem:[#allocation5 + $0x284] ss:$20 sps:$4 sm:$0xff]   ;;  %v4153_v30 = vld [vmem:[#allocation5] ss:$20 sps:$4 sm:$0xff]   ;;  %v4157_v31 = vld [vmem:[#allocation5 + $0x25c] ss:$20 sps:$4 sm:$0xff]  }
  0x40   :  { %1432 = vmatprep.subr.bf16.mxu0 %v4127_v11  ;;  %1472 = vmatpush1.bf16.msra.mxu1 %v4126_v12  ;;  %v4156_v32 = vld [vmem:[#allocation5 + $0x280] ss:$20 sps:$4 sm:$0xff]   ;;  %v4160_v33 = vld [vmem:[#allocation5 + $0x4dc] ss:$20 sps:$4 sm:$0xff]   ;;  %v4159_v34 = vld [vmem:[#allocation5 + $0x258] ss:$20 sps:$4 sm:$0xff]  }
  0x41   :  { %1473 = vmatprep.subr.bf16.mxu1 %v4130_v13  ;;  %v4784_v35 = vmov 1966171168   ;;  %v4163_v38 = vld [vmem:[#allocation5 + $0x234] ss:$20 sps:$4 sm:$0xff]   ;;  %v4162_v39 = vld [vmem:[#allocation5 + $0x4d8] ss:$20 sps:$4 sm:$0xff]  }
  0x42   :  { %v318_v36 = vunpack.c.l.s4 %v4784_v35  ;;  %v4166_v40 = vld [vmem:[#allocation5 + $0x4b4] ss:$20 sps:$4 sm:$0xff]   ;;  %v4165_v41 = vld [vmem:[#allocation5 + $0x230] ss:$20 sps:$4 sm:$0xff]   ;;  %v4838_v43 = vshrl.u32 %v320_v37, 7  ;;  %vm4787_vm0 = vmmov 0  }
  0x43   :  { %1433 = vmatpush1.bf16.msra.mxu0 %v4129_v14  ;;  %v4169_v44 = vld [vmem:[#allocation5 + $0x20c] ss:$20 sps:$4 sm:$0xff]   ;;  %v4168_v45 = vld [vmem:[#allocation5 + $0x4b0] ss:$20 sps:$4 sm:$0xff]   ;;  %v4171_v47 = vld [vmem:[#allocation5 + $0x208] ss:$20 sps:$4 sm:$0xff]  }
  0x44   :  { %1434 = vmatprep.subr.bf16.mxu0 %v4133_v15  ;;  %1474 = vmatpush1.bf16.msra.mxu1 %v4132_v16  ;;  %v319_v42 = vunpack.c.0.s8 %v318_v36  ;;  %v4172_v46 = vld [vmem:[#allocation5 + $0x48c] ss:$20 sps:$4 sm:$0xff]   ;;  %v4175_v49 = vld [vmem:[#allocation5 + $0x1e4] ss:$20 sps:$4 sm:$0xff]   ;;  %v4174_v50 = vld [vmem:[#allocation5 + $0x488] ss:$20 sps:$4 sm:$0xff]  }
  0x45   :  { %1475 = vmatprep.subr.bf16.mxu1 %v4136_v17  ;;  %v4178_v51 = vld [vmem:[#allocation5 + $0x464] ss:$20 sps:$4 sm:$0xff]   ;;  %v4177_v53 = vld [vmem:[#allocation5 + $0x1e0] ss:$20 sps:$4 sm:$0xff]   ;;  %v4181_v55 = vld [vmem:[#allocation5 + $0x1bc] ss:$20 sps:$4 sm:$0xff]  }
  0x46   :  { %v4841_v48 = vsub.s32 %v319_v42, %v4838_v43  ;;  %v4843_v52 = vld [vmem:[#allocation2] sm:$0x1f]  ;;  %v4180_v56 = vld [vmem:[#allocation5 + $0x460] ss:$20 sps:$4 sm:$0xff]   ;;  %v4189_v1 = vld [vmem:[#allocation5 + $0x190] ss:$20 sps:$4 sm:$0xff]  }
  0x47   :  { %1435 = vmatpush1.bf16.msra.mxu0 %v4135_v18  ;;  %v4184_v58 = vld [vmem:[#allocation5 + $0x43c] ss:$20 sps:$4 sm:$0xff]   ;;  %v4183_v59 = vld [vmem:[#allocation5 + $0x1b8] ss:$20 sps:$4 sm:$0xff]   ;;  %v4187_v61 = vld [vmem:[#allocation5 + $0x194] ss:$20 sps:$4 sm:$0xff]  }
  0x48   :  { %1436 = vmatprep.subr.bf16.mxu0 %v4139_v19  ;;  %1476 = vmatpush1.bf16.msra.mxu1 %v4138_v20  ;;  %v323_v54 = vrot.slane %v4843_v52, %v4841_v48  ;;  %v4186_v62 = vld [vmem:[#allocation5 + $0x438] ss:$20 sps:$4 sm:$0xff]   ;;  %v4190_v0 = vld [vmem:[#allocation5 + $0x414] ss:$20 sps:$4 sm:$0xff]   ;;  %v4192_v3 = vld [vmem:[#allocation5 + $0x410] ss:$20 sps:$4 sm:$0xff]  }
  0x49   :  { %1477 = vmatprep.subr.bf16.mxu1 %v4142_v21  ;;  %v4193_v2 = vld [vmem:[#allocation5 + $0x16c] ss:$20 sps:$4 sm:$0xff]   ;;  %v4195_v5 = vld [vmem:[#allocation5 + $0x168] ss:$20 sps:$4 sm:$0xff]   ;;  %v4199_v6 = vld [vmem:[#allocation5 + $0x144] ss:$20 sps:$4 sm:$0xff]  }
  0x4a   :  { %v331_v57 = vcombine.high %v323_v54, %v323_v54  ;;  %v4196_v4 = vld [vmem:[#allocation5 + $0x3ec] ss:$20 sps:$4 sm:$0xff]   ;;  %v4198_v7 = vld [vmem:[#allocation5 + $0x3e8] ss:$20 sps:$4 sm:$0xff]   ;;  %v4202_v8 = vld [vmem:[#allocation5 + $0x3c4] ss:$20 sps:$4 sm:$0xff]   ;;  %v4857_v10 = vrot.slane %v323_v54, %v4841_v48 }
  0x4b   :  { %1437 = vmatpush1.bf16.msra.mxu0 %v4141_v22  ;;  %v4201_v9 = vld [vmem:[#allocation5 + $0x140] ss:$20 sps:$4 sm:$0xff]   ;;  %v4207_v11 = vld [vmem:[#allocation5 + $0x61c] ss:$20 sps:$4 sm:$0xff]   ;;  %v4210_v13 = vld [vmem:[#allocation5 + $0x124] ss:$20 sps:$4 sm:$0xff]  }
  0x4c   :  { %1438 = vmatprep.subr.bf16.mxu0 %v4145_v23  ;;  %1478 = vmatpush1.bf16.msra.mxu1 %v4144_v24  ;;  %v4848_v60 = vrot.slane %v331_v57, %v4841_v48  ;;  %v4204_v12 = vld [vmem:[#allocation5 + $0x3c0] ss:$20 sps:$4 sm:$0xff]   ;;  %v4205_v14 = vld [vmem:[#allocation5 + $0x618] ss:$20 sps:$4 sm:$0xff]   ;;  %v4861_v15 = vcombine.high %v4857_v10, %v4857_v10  ;;  %v4216_v18 = vld [vmem:[#allocation5 + $0xfc] ss:$20 sps:$4 sm:$0xff]  }
  0x4d   :  { %1479 = vmatprep.subr.bf16.mxu1 %v4148_v25  ;;  %v4213_v16 = vld [vmem:[#allocation5 + $0x5f4] ss:$20 sps:$4 sm:$0xff]   ;;  %v4211_v19 = vld [vmem:[#allocation5 + $0x5f0] ss:$20 sps:$4 sm:$0xff]   ;;  %v4785_v20 = vmov 0   ;;  %vm3532_vm6 = vcmp.lt.s32.totalorder %v320_v37, 640 }
  0x4e   :  { %1458 = vmatprep.mubr.bf16.mxu0 %v4848_v60  ;;  %v4853_v63 = vcombine.high %v4848_v60, %v4848_v60  ;;  %v4208_v17 = vld [vmem:[#allocation5 + $0x120] ss:$20 sps:$4 sm:$0xff]   ;;  %v4214_v22 = vld [vmem:[#allocation5 + $0xf8] ss:$20 sps:$4 sm:$0xff]   ;;  %v4217_v24 = vld [vmem:[#allocation5 + $0x5c8] ss:$20 sps:$4 sm:$0xff]  }
  0x4f   :  { %1439 = vmatpush1.bf16.msra.mxu0 %v4147_v26  ;;  %v4219_v21 = vld [vmem:[#allocation5 + $0x5cc] ss:$20 sps:$4 sm:$0xff]   ;;  %v4222_v23 = vld [vmem:[#allocation5 + $0xd4] ss:$20 sps:$4 sm:$0xff]   ;;  %v4225_v25 = vld [vmem:[#allocation5 + $0x5a4] ss:$20 sps:$4 sm:$0xff]  }
  0x50   :  { %1440 = vmatprep.subr.bf16.mxu0 %v4151_v27  ;;  %1480 = vmatpush1.bf16.msra.mxu1 %v4150_v28  ;;  %v4220_v26 = vld [vmem:[#allocation5 + $0xd0] ss:$20 sps:$4 sm:$0xff]   ;;  %v4228_v27 = vld [vmem:[#allocation5 + $0xac] ss:$20 sps:$4 sm:$0xff]   ;;  %v4241_v42 = vld [vmem:[#allocation5 + $0x528] ss:$20 sps:$4 sm:$0xff]  }
  0x51   :  { %1481 = vmatprep.subr.bf16.mxu1 %v4154_v29  ;;  %1499 = vmatprep.mubr.bf16.mxu1 %v4853_v63  ;;  %v4223_v28 = vld [vmem:[#allocation5 + $0x5a0] ss:$20 sps:$4 sm:$0xff]   ;;  %v4231_v29 = vld [vmem:[#allocation5 + $0x57c] ss:$20 sps:$4 sm:$0xff]  }
  0x52   :  { %v4240_v35 = vld [vmem:[#allocation5 + $0x5c] ss:$20 sps:$4 sm:$0xff]   ;;  %v4254_v54 = vld [vmem:[#allocation5 + $0x3a0] ss:$20 sps:$4 sm:$0xff]  }
  0x53   :  { %1441 = vmatpush1.bf16.msra.mxu0 %v4153_v30  ;;  %v4226_v30 = vld [vmem:[#allocation5 + $0xa8] ss:$20 sps:$4 sm:$0xff]   ;;  %v4235_v36 = vld [vmem:[#allocation5 + $0x550] ss:$20 sps:$4 sm:$0xff]  }
  0x54   :  { %1442 = vmatprep.subr.bf16.mxu0 %v4157_v31  ;;  %1482 = vmatpush1.bf16.msra.mxu1 %v4156_v32  ;;  %v4234_v31 = vld [vmem:[#allocation5 + $0x84] ss:$20 sps:$4 sm:$0xff]   ;;  %v4265_v57 = vld [vmem:[#allocation5 + $0x23c] ss:$20 sps:$4 sm:$0xff]  }
  0x55   :  { %1483 = vmatprep.subr.bf16.mxu1 %v4160_v33  ;;  %v4229_v32 = vld [vmem:[#allocation5 + $0x578] ss:$20 sps:$4 sm:$0xff]   ;;  %v4237_v33 = vld [vmem:[#allocation5 + $0x554] ss:$20 sps:$4 sm:$0xff]  }
  0x57   :  { %1443 = vmatpush2.bf16.msra.mxu0 %v4159_v34  ;;  %v4232_v34 = vld [vmem:[#allocation5 + $0x80] ss:$20 sps:$4 sm:$0xff]  }
  0x58   :  { %1444 = vmatprep.subr.bf16.mxu0 %v4163_v38  ;;  %1484 = vmatpush2.bf16.msra.mxu1 %v4162_v39  ;;  %v4243_v38 = vld [vmem:[#allocation5 + $0x52c] ss:$20 sps:$4 sm:$0xff]  }
  0x59   :  { %1485 = vmatprep.subr.bf16.mxu1 %v4166_v40  ;;  %v4238_v39 = vld [vmem:[#allocation5 + $0x58] ss:$20 sps:$4 sm:$0xff]   ;;  %v4246_v40 = vld [vmem:[#allocation5 + $0x34] ss:$20 sps:$4 sm:$0xff]  }
  0x5b   :  { %1445 = vmatpush2.bf16.msra.mxu0 %v4165_v41  ;;  %v316_v41 = vcombine.high %v4843_v52, %v4843_v52  ;;  %v4259_v52 = vld [vmem:[#allocation5 + $0x264] ss:$20 sps:$4 sm:$0xff]  }
  0x5c   :  { %1446 = vmatprep.subr.bf16.mxu0 %v4169_v44  ;;  %1486 = vmatpush2.bf16.msra.mxu1 %v4168_v45  ;;  %v4249_v44 = vld [vmem:[#allocation5 + $0x504] ss:$20 sps:$4 sm:$0xff]  }
  0x5d   :  { %1487 = vmatprep.subr.bf16.mxu1 %v4172_v46  ;;  %v4244_v45 = vld [vmem:[#allocation5 + $0x30] ss:$20 sps:$4 sm:$0xff]   ;;  %v4252_v46 = vld [vmem:[#allocation5 + $0xc] ss:$20 sps:$4 sm:$0xff]  }
  0x5f   :  { %1447 = vmatpush2.bf16.msra.mxu0 %v4171_v47  ;;  %v330_v47 = vrot.slane %v316_v41, %v4841_v48  ;;  %v4328_v41 = vld [vmem:[#allocation5 + $0x444] ss:$20 sps:$4 sm:$0xff]  }
  0x60   :  { %1448 = vmatprep.subr.bf16.mxu0 %v4175_v49  ;;  %1488 = vmatpush2.bf16.msra.mxu1 %v4174_v50  ;;  %v4247_v49 = vld [vmem:[#allocation5 + $0x500] ss:$20 sps:$4 sm:$0xff]   ;;  %v4256_v50 = vld [vmem:[#allocation5 + $0x3a4] ss:$20 sps:$4 sm:$0xff]  }
  0x61   :  { %1489 = vmatprep.subr.bf16.mxu1 %v4178_v51  ;;  %v4250_v51 = vld [vmem:[#allocation5 + $0x8] ss:$20 sps:$4 sm:$0xff]  }
  0x63   :  { %1449 = vmatpush2.bf16.msra.mxu0 %v4177_v53  ;;  %v4871_v53 = vrot.slane %v330_v47, %v4841_v48  ;;  %v4329_v47 = vld [vmem:[#allocation5 + $0x580] ss:$20 sps:$4 sm:$0xff]  }
  0x64   :  { %1450 = vmatprep.subr.bf16.mxu0 %v4181_v55  ;;  %1490 = vmatpush2.bf16.msra.mxu1 %v4180_v56  ;;  %v4262_v55 = vld [vmem:[#allocation5 + $0x37c] ss:$20 sps:$4 sm:$0xff]   ;;  %v4257_v56 = vld [vmem:[#allocation5 + $0x260] ss:$20 sps:$4 sm:$0xff]  }
  0x65   :  { %1491 = vmatprep.subr.bf16.mxu1 %v4184_v58  ;;  %v4260_v58 = vld [vmem:[#allocation5 + $0x378] ss:$20 sps:$4 sm:$0xff]  }
  0x67   :  { %1451 = vmatpush2.bf16.msra.mxu0 %v4183_v59  ;;  %v4268_v59 = vld [vmem:[#allocation5 + $0x354] ss:$20 sps:$4 sm:$0xff]  }
  0x68   :  { %1452 = vmatprep.subr.bf16.mxu0 %v4187_v61  ;;  %1492 = vmatpush2.bf16.msra.mxu1 %v4186_v62  ;;  %v4263_v61 = vld [vmem:[#allocation5 + $0x238] ss:$20 sps:$4 sm:$0xff]   ;;  %v4271_v62 = vld [vmem:[#allocation5 + $0x214] ss:$20 sps:$4 sm:$0xff]  }
  0x69   :  { %1493 = vmatprep.subr.bf16.mxu1 %v4190_v0  ;;  %v4266_v0 = vld [vmem:[#allocation5 + $0x350] ss:$20 sps:$4 sm:$0xff]  }
  0x6b   :  { %1453 = vmatpush2.bf16.msra.mxu0 %v4189_v1  ;;  %v4274_v1 = vld [vmem:[#allocation5 + $0x32c] ss:$20 sps:$4 sm:$0xff]  }
  0x6c   :  { %1454 = vmatprep.subr.bf16.mxu0 %v4193_v2  ;;  %1494 = vmatpush2.bf16.msra.mxu1 %v4192_v3  ;;  %v4269_v2 = vld [vmem:[#allocation5 + $0x210] ss:$20 sps:$4 sm:$0xff]   ;;  %v4277_v3 = vld [vmem:[#allocation5 + $0x1ec] ss:$20 sps:$4 sm:$0xff]  }
  0x6d   :  { %1495 = vmatprep.subr.bf16.mxu1 %v4196_v4  ;;  %v4272_v4 = vld [vmem:[#allocation5 + $0x328] ss:$20 sps:$4 sm:$0xff]  }
  0x6f   :  { %1455 = vmatpush2.bf16.msra.mxu0 %v4195_v5  ;;  %v4280_v5 = vld [vmem:[#allocation5 + $0x304] ss:$20 sps:$4 sm:$0xff]  }
  0x70   :  { %1456 = vmatprep.subr.bf16.mxu0 %v4199_v6  ;;  %1496 = vmatpush2.bf16.msra.mxu1 %v4198_v7  ;;  %v4275_v6 = vld [vmem:[#allocation5 + $0x1e8] ss:$20 sps:$4 sm:$0xff]   ;;  %v4283_v7 = vld [vmem:[#allocation5 + $0x1c4] ss:$20 sps:$4 sm:$0xff]  }
  0x71   :  { %1497 = vmatprep.subr.bf16.mxu1 %v4202_v8  ;;  %v4278_v8 = vld [vmem:[#allocation5 + $0x300] ss:$20 sps:$4 sm:$0xff]  }
  0x73   :  { %1457 = vmatpush2.bf16.msra.mxu0 %v4201_v9  ;;  %v4286_v9 = vld [vmem:[#allocation5 + $0x2dc] ss:$20 sps:$4 sm:$0xff]  }
  0x74   :  { %1508 = vmatprep.subr.bf16.mxu0 %v4207_v11  ;;  %1498 = vmatpush2.bf16.msra.mxu1 %v4204_v12  ;;  %v4281_v11 = vld [vmem:[#allocation5 + $0x1c0] ss:$20 sps:$4 sm:$0xff]   ;;  %v4289_v12 = vld [vmem:[#allocation5 + $0x19c] ss:$20 sps:$4 sm:$0xff]  }
  0x75   :  { %1549 = vmatprep.subr.bf16.mxu1 %v4210_v13  ;;  %v4284_v13 = vld [vmem:[#allocation5 + $0x2d8] ss:$20 sps:$4 sm:$0xff]  }
  0x76   :  { %1459 = vmatmul.mubr.bf16.vlgmr.msra.gmra.mxu0 %v4857_v10 }
  0x77   :  { %1509 = vmatpush1.bf16.msra.mxu0 %v4205_v14  ;;  %1540 = vmatprep.mubr.bf16.mxu0 %v4785_v20  ;;  %v4292_v14 = vld [vmem:[#allocation5 + $0x2b4] ss:$20 sps:$4 sm:$0xff]  }
  0x78   :  { %1500 = vmatmul.mubr.bf16.vlgmr.msra.gmra.mxu1 %v4861_v15  ;;  %1510 = vmatprep.subr.bf16.mxu0 %v4213_v16  ;;  %v4287_v16 = vld [vmem:[#allocation5 + $0x198] ss:$20 sps:$4 sm:$0xff]  }
  0x79   :  { %1550 = vmatpush1.bf16.msra.mxu1 %v4208_v17  ;;  %1581 = vmatprep.mubr.bf16.mxu1 %v4848_v60  ;;  %v4295_v17 = vld [vmem:[#allocation5 + $0x174] ss:$20 sps:$4 sm:$0xff]  }
  0x7a   :  { %1551 = vmatprep.subr.bf16.mxu1 %v4216_v18  ;;  %v4290_v18 = vld [vmem:[#allocation5 + $0x2b0] ss:$20 sps:$4 sm:$0xff]  }
  0x7b   :  { %1511 = vmatpush1.bf16.msra.mxu0 %v4211_v19  ;;  %v4298_v19 = vld [vmem:[#allocation5 + $0x28c] ss:$20 sps:$4 sm:$0xff]  }
  0x7c   :  { %1512 = vmatprep.subr.bf16.mxu0 %v4219_v21  ;;  %v4293_v21 = vld [vmem:[#allocation5 + $0x170] ss:$20 sps:$4 sm:$0xff]  }
  0x7d   :  { %1552 = vmatpush1.bf16.msra.mxu1 %v4214_v22  ;;  %v4301_v22 = vld [vmem:[#allocation5 + $0x14c] ss:$20 sps:$4 sm:$0xff]  }
  0x7e   :  { %1553 = vmatprep.subr.bf16.mxu1 %v4222_v23  ;;  %v4296_v23 = vld [vmem:[#allocation5 + $0x288] ss:$20 sps:$4 sm:$0xff]  }
  0x7f   :  { %1513 = vmatpush1.bf16.msra.mxu0 %v4217_v24  ;;  %v4304_v24 = vld [vmem:[#allocation5 + $0x4e4] ss:$20 sps:$4 sm:$0xff]  }
  0x80   :  { %1514 = vmatprep.subr.bf16.mxu0 %v4225_v25  ;;  %v4299_v25 = vld [vmem:[#allocation5 + $0x148] ss:$20 sps:$4 sm:$0xff]  }
  0x81   :  { %1554 = vmatpush1.bf16.msra.mxu1 %v4220_v26  ;;  %v4307_v26 = vld [vmem:[#allocation5 + $0x624] ss:$20 sps:$4 sm:$0xff]  }
  0x82   :  { %1555 = vmatprep.subr.bf16.mxu1 %v4228_v27  ;;  %v4302_v27 = vld [vmem:[#allocation5 + $0x4e0] ss:$20 sps:$4 sm:$0xff]  }
  0x83   :  { %1515 = vmatpush1.bf16.msra.mxu0 %v4223_v28  ;;  %v4310_v28 = vld [vmem:[#allocation5 + $0x4bc] ss:$20 sps:$4 sm:$0xff]  }
  0x84   :  { %1516 = vmatprep.subr.bf16.mxu0 %v4231_v29  ;;  %v4305_v29 = vld [vmem:[#allocation5 + $0x620] ss:$20 sps:$4 sm:$0xff]  }
  0x85   :  { %1556 = vmatpush1.bf16.msra.mxu1 %v4226_v30  ;;  %v4313_v30 = vld [vmem:[#allocation5 + $0x5fc] ss:$20 sps:$4 sm:$0xff]  }
  0x86   :  { %1557 = vmatprep.subr.bf16.mxu1 %v4234_v31  ;;  %v4308_v31 = vld [vmem:[#allocation5 + $0x4b8] ss:$20 sps:$4 sm:$0xff]  }
  0x87   :  { %1517 = vmatpush1.bf16.msra.mxu0 %v4229_v32  ;;  %v4316_v32 = vld [vmem:[#allocation5 + $0x494] ss:$20 sps:$4 sm:$0xff]  }
  0x88   :  { %1518 = vmatprep.subr.bf16.mxu0 %v4237_v33  ;;  %v4311_v33 = vld [vmem:[#allocation5 + $0x5f8] ss:$20 sps:$4 sm:$0xff]  }
  0x89   :  { %1558 = vmatpush1.bf16.msra.mxu1 %v4232_v34  ;;  %v4319_v34 = vld [vmem:[#allocation5 + $0x5d4] ss:$20 sps:$4 sm:$0xff]  }
  0x8a   :  { %1559 = vmatprep.subr.bf16.mxu1 %v4240_v35  ;;  %v4314_v35 = vld [vmem:[#allocation5 + $0x490] ss:$20 sps:$4 sm:$0xff]  }
  0x8b   :  { %1519 = vmatpush1.bf16.msra.mxu0 %v4235_v36  ;;  %v4322_v36 = vld [vmem:[#allocation5 + $0x46c] ss:$20 sps:$4 sm:$0xff]  }
  0x8c   :  { %1520 = vmatprep.subr.bf16.mxu0 %v4243_v38  ;;  %v4317_v38 = vld [vmem:[#allocation5 + $0x5d0] ss:$20 sps:$4 sm:$0xff]  }
  0x8d   :  { %1560 = vmatpush1.bf16.msra.mxu1 %v4238_v39  ;;  %v4325_v39 = vld [vmem:[#allocation5 + $0x5ac] ss:$20 sps:$4 sm:$0xff]  }
  0x8e   :  { %1561 = vmatprep.subr.bf16.mxu1 %v4246_v40  ;;  %v4320_v40 = vld [vmem:[#allocation5 + $0x468] ss:$20 sps:$4 sm:$0xff]  }
  0x8f   :  { %1521 = vmatpush1.bf16.msra.mxu0 %v4241_v42  ;;  %v4323_v42 = vld [vmem:[#allocation5 + $0x5a8] ss:$20 sps:$4 sm:$0xff]  }
  0x90   :  { %1522 = vmatprep.subr.bf16.mxu0 %v4249_v44  ;;  %v4331_v44 = vld [vmem:[#allocation5 + $0x584] ss:$20 sps:$4 sm:$0xff]  }
  0x91   :  { %1562 = vmatpush1.bf16.msra.mxu1 %v4244_v45  ;;  %v4326_v45 = vld [vmem:[#allocation5 + $0x440] ss:$20 sps:$4 sm:$0xff]  }
  0x92   :  { %1563 = vmatprep.subr.bf16.mxu1 %v4252_v46  ;;  %v4334_v46 = vld [vmem:[#allocation5 + $0x41c] ss:$20 sps:$4 sm:$0xff]  }
  0x93   :  { %1523 = vmatpush1.bf16.msra.mxu0 %v4247_v49  ;;  %v4337_v49 = vld [vmem:[#allocation5 + $0x55c] ss:$20 sps:$4 sm:$0xff]  }
  0x94   :  { %1590 = vmatprep.subr.bf16.mxu0 %v4256_v50  ;;  %v4332_v50 = vld [vmem:[#allocation5 + $0x418] ss:$20 sps:$4 sm:$0xff]  }
  0x95   :  { %1564 = vmatpush1.bf16.msra.mxu1 %v4250_v51  ;;  %v4340_v51 = vld [vmem:[#allocation5 + $0x3f4] ss:$20 sps:$4 sm:$0xff]  }
  0x96   :  { %1541 = vmatmul.mubr.bf16.vlgmr.msra.gmra.mxu0 %v4871_v53  ;;  %1565 = vmatprep.subr.bf16.mxu1 %v4259_v52  ;;  %v4335_v52 = vld [vmem:[#allocation5 + $0x558] ss:$20 sps:$4 sm:$0xff]  }
  0x97   :  { %1591 = vmatpush1.bf16.msra.mxu0 %v4254_v54  ;;  %1622 = vmatprep.mubr.bf16.mxu0 %v4853_v63  ;;  %v4343_v54 = vld [vmem:[#allocation5 + $0x534] ss:$20 sps:$4 sm:$0xff]  }
  0x98   :  { %1592 = vmatprep.subr.bf16.mxu0 %v4262_v55  ;;  %v4338_v55 = vld [vmem:[#allocation5 + $0x3f0] ss:$20 sps:$4 sm:$0xff]  }
  0x99   :  { %1566 = vmatpush2.bf16.msra.mxu1 %v4257_v56  ;;  %v4346_v56 = vld [vmem:[#allocation5 + $0x3cc] ss:$20 sps:$4 sm:$0xff]  }
  0x9a   :  { %1567 = vmatprep.subr.bf16.mxu1 %v4265_v57  ;;  %v4341_v57 = vld [vmem:[#allocation5 + $0x530] ss:$20 sps:$4 sm:$0xff]  }
  0x9b   :  { %1593 = vmatpush1.bf16.msra.mxu0 %v4260_v58  ;;  %v4349_v58 = vld [vmem:[#allocation5 + $0x50c] ss:$20 sps:$4 sm:$0xff]  }
  0x9c   :  { %1594 = vmatprep.subr.bf16.mxu0 %v4268_v59  ;;  %v4344_v59 = vld [vmem:[#allocation5 + $0x3c8] ss:$20 sps:$4 sm:$0xff]  }
  0x9d   :  { %1568 = vmatpush2.bf16.msra.mxu1 %v4263_v61  ;;  %v4350_v61 = vld [vmem:[#allocation5 + $0x268] ss:$20 sps:$4 sm:$0xff]  }
  0x9e   :  { %1569 = vmatprep.subr.bf16.mxu1 %v4271_v62  ;;  %v4347_v62 = vld [vmem:[#allocation5 + $0x508] ss:$20 sps:$4 sm:$0xff]  }
  0x9f   :  { %1595 = vmatpush1.bf16.msra.mxu0 %v4266_v0  ;;  %v4352_v0 = vld [vmem:[#allocation5 + $0x4e8] ss:$20 sps:$4 sm:$0xff]  }
  0xa0   :  { %1596 = vmatprep.subr.bf16.mxu0 %v4274_v1  ;;  %v4351_v1 = vld [vmem:[#allocation5 + $0x128] ss:$20 sps:$4 sm:$0xff]  }
  0xa1   :  { %1570 = vmatpush2.bf16.msra.mxu1 %v4269_v2  ;;  %v4354_v2 = vld [vmem:[#allocation5 + $0x240] ss:$20 sps:$4 sm:$0xff]  }
  0xa2   :  { %1571 = vmatprep.subr.bf16.mxu1 %v4277_v3  ;;  %v4353_v3 = vld [vmem:[#allocation5 + $0x3a8] ss:$20 sps:$4 sm:$0xff]  }
  0xa3   :  { %1597 = vmatpush1.bf16.msra.mxu0 %v4272_v4  ;;  %v4356_v4 = vld [vmem:[#allocation5 + $0x4c0] ss:$20 sps:$4 sm:$0xff]  }
  0xa4   :  { %1598 = vmatprep.subr.bf16.mxu0 %v4280_v5  ;;  %v4355_v5 = vld [vmem:[#allocation5 + $0x100] ss:$20 sps:$4 sm:$0xff]  }
  0xa5   :  { %1572 = vmatpush2.bf16.msra.mxu1 %v4275_v6  ;;  %v4358_v6 = vld [vmem:[#allocation5 + $0x218] ss:$20 sps:$4 sm:$0xff]  }
  0xa6   :  { %1573 = vmatprep.subr.bf16.mxu1 %v4283_v7  ;;  %v4357_v7 = vld [vmem:[#allocation5 + $0x380] ss:$20 sps:$4 sm:$0xff]  }
  0xa7   :  { %1599 = vmatpush1.bf16.msra.mxu0 %v4278_v8  ;;  %v4359_v8 = vld [vmem:[#allocation5 + $0xd8] ss:$20 sps:$4 sm:$0xff]  }
  0xa8   :  { %1600 = vmatprep.subr.bf16.mxu0 %v4286_v9  ;;  %v4360_v9 = vld [vmem:[#allocation5 + $0x498] ss:$20 sps:$4 sm:$0xff]  }
  0xa9   :  { %1574 = vmatpush2.bf16.msra.mxu1 %v4281_v11  ;;  %v4361_v11 = vld [vmem:[#allocation5 + $0x358] ss:$20 sps:$4 sm:$0xff]  }
  0xaa   :  { %1575 = vmatprep.subr.bf16.mxu1 %v4289_v12  ;;  %v4362_v12 = vld [vmem:[#allocation5 + $0x1f0] ss:$20 sps:$4 sm:$0xff]  }
  0xab   :  { %1601 = vmatpush1.bf16.msra.mxu0 %v4284_v13  ;;  %v4364_v13 = vld [vmem:[#allocation5 + $0x470] ss:$20 sps:$4 sm:$0xff]  }
  0xac   :  { %1602 = vmatprep.subr.bf16.mxu0 %v4292_v14  ;;  %v4363_v14 = vld [vmem:[#allocation5 + $0xb0] ss:$20 sps:$4 sm:$0xff]  }
  0xad   :  { %1576 = vmatpush2.bf16.msra.mxu1 %v4287_v16  ;;  %v4365_v16 = vld [vmem:[#allocation5 + $0x330] ss:$20 sps:$4 sm:$0xff]  }
  0xae   :  { %1577 = vmatprep.subr.bf16.mxu1 %v4295_v17  ;;  %v4368_v17 = vld [vmem:[#allocation5 + $0x448] ss:$20 sps:$4 sm:$0xff]  }
  0xaf   :  { %1603 = vmatpush1.bf16.msra.mxu0 %v4290_v18  ;;  %v4367_v18 = vld [vmem:[#allocation5 + $0x88] ss:$20 sps:$4 sm:$0xff]  }
  0xb0   :  { %1604 = vmatprep.subr.bf16.mxu0 %v4298_v19  ;;  %v4369_v19 = vld [vmem:[#allocation5 + $0x308] ss:$20 sps:$4 sm:$0xff]  }
  0xb1   :  { %1578 = vmatpush2.bf16.msra.mxu1 %v4293_v21  ;;  %v4372_v21 = vld [vmem:[#allocation5 + $0x420] ss:$20 sps:$4 sm:$0xff]  }
  0xb2   :  { %1579 = vmatprep.subr.bf16.mxu1 %v4301_v22  ;;  %v4371_v22 = vld [vmem:[#allocation5 + $0x60] ss:$20 sps:$4 sm:$0xff]  }
  0xb3   :  { %1605 = vmatpush1.bf16.msra.mxu0 %v4296_v23  ;;  %v4374_v23 = vld [vmem:[#allocation5 + $0x178] ss:$20 sps:$4 sm:$0xff]  }
  0xb4   :  { %1606 = vmatprep.subr.bf16.mxu0 %v4304_v24  ;;  %v4373_v24 = vld [vmem:[#allocation5 + $0x2e0] ss:$20 sps:$4 sm:$0xff]  }
  0xb5   :  { %1580 = vmatpush2.bf16.msra.mxu1 %v4299_v25  ;;  %v4375_v25 = vld [vmem:[#allocation5 + $0x38] ss:$20 sps:$4 sm:$0xff]  }
  0xb6   :  { %1631 = vmatprep.subr.bf16.mxu1 %v4307_v26  ;;  %v4376_v26 = vld [vmem:[#allocation5 + $0x3f8] ss:$20 sps:$4 sm:$0xff]  }
  0xb7   :  { %1607 = vmatpush2.bf16.msra.mxu0 %v4302_v27  ;;  %v4377_v27 = vld [vmem:[#allocation5 + $0x2b8] ss:$20 sps:$4 sm:$0xff]  }
  0xb8   :  { %1582 = vmatmul.mubr.bf16.vlgmr.msra.gmra.mxu1 %v4857_v10  ;;  %1608 = vmatprep.subr.bf16.mxu0 %v4310_v28  ;;  %v4378_v28 = vld [vmem:[#allocation5 + $0x150] ss:$20 sps:$4 sm:$0xff]  }
  0xb9   :  { %1632 = vmatpush1.bf16.msra.mxu1 %v4305_v29  ;;  %1663 = vmatprep.mubr.bf16.mxu1 %v4785_v20  ;;  %v4380_v29 = vld [vmem:[#allocation5 + $0x3d0] ss:$20 sps:$4 sm:$0xff]  }
  0xba   :  { %1633 = vmatprep.subr.bf16.mxu1 %v4313_v30  ;;  %v4379_v30 = vld [vmem:[#allocation5 + $0x10] ss:$20 sps:$4 sm:$0xff]  }
  0xbb   :  { %1609 = vmatpush2.bf16.msra.mxu0 %v4308_v31  ;;  %v4381_v31 = vld [vmem:[#allocation5 + $0x290] ss:$20 sps:$4 sm:$0xff]  }
  0xbc   :  { %1610 = vmatprep.subr.bf16.mxu0 %v4316_v32  ;;  %v4392_v32 = vld [vmem:[#allocation8 + $0x11c] ss:$20 sps:$4 sm:$0xff]  }
  0xbd   :  { %1634 = vmatpush1.bf16.msra.mxu1 %v4311_v33  ;;  %v4382_v33 = vld [vmem:[#allocation5 + $0x628] ss:$20 sps:$4 sm:$0xff]  }
  0xbe   :  { %1635 = vmatprep.subr.bf16.mxu1 %v4319_v34  ;;  %v4390_v34 = vld [vmem:[#allocation8 + $0x118] ss:$20 sps:$4 sm:$0xff]  }
  0xbf   :  { %1611 = vmatpush2.bf16.msra.mxu0 %v4314_v35  ;;  %v4786_v35 = vmov 0.0  }
  0xc0   :  { %1612 = vmatprep.subr.bf16.mxu0 %v4322_v36  ;;  %v4395_v36 = vld [vmem:[#allocation8 + $0xf4] ss:$20 sps:$4 sm:$0xff]  }
  0xc1   :  { %1636 = vmatpush1.bf16.msra.mxu1 %v4317_v38  ;;  %v4383_v38 = vld [vmem:[#allocation5 + $0x600] ss:$20 sps:$4 sm:$0xff]  }
  0xc2   :  { %1637 = vmatprep.subr.bf16.mxu1 %v4325_v39  ;;  %v4393_v39 = vld [vmem:[#allocation8 + $0xf0] ss:$20 sps:$4 sm:$0xff]  }
  0xc3   :  { %1613 = vmatpush2.bf16.msra.mxu0 %v4320_v40  ;;  %v4398_v40 = vld [vmem:[#allocation8 + $0xcc] ss:$20 sps:$4 sm:$0xff]  }
  0xc4   :  { %1614 = vmatprep.subr.bf16.mxu0 %v4328_v41  ;;  %v4384_v41 = vld [vmem:[#allocation5 + $0x5d8] ss:$20 sps:$4 sm:$0xff]  }
  0xc5   :  { %1638 = vmatpush1.bf16.msra.mxu1 %v4323_v42  ;;  %v4396_v42 = vld [vmem:[#allocation8 + $0xc8] ss:$20 sps:$4 sm:$0xff]  }
  0xc6   :  { %1639 = vmatprep.subr.bf16.mxu1 %v4331_v44  ;;  %v4401_v44 = vld [vmem:[#allocation8 + $0xa4] ss:$20 sps:$4 sm:$0xff]  }
  0xc7   :  { %1615 = vmatpush2.bf16.msra.mxu0 %v4326_v45  ;;  %v4399_v45 = vld [vmem:[#allocation8 + $0xa0] ss:$20 sps:$4 sm:$0xff]  }
  0xc8   :  { %1616 = vmatprep.subr.bf16.mxu0 %v4334_v46  ;;  %v4404_v46 = vld [vmem:[#allocation8 + $0x7c] ss:$20 sps:$4 sm:$0xff]  }
  0xc9   :  { %1640 = vmatpush1.bf16.msra.mxu1 %v4329_v47  ;;  %v4402_v47 = vld [vmem:[#allocation8 + $0x78] ss:$20 sps:$4 sm:$0xff]  }
  0xca   :  { %1641 = vmatprep.subr.bf16.mxu1 %v4337_v49  ;;  %v4407_v49 = vld [vmem:[#allocation8 + $0x54] ss:$20 sps:$4 sm:$0xff]  }
  0xcb   :  { %1617 = vmatpush2.bf16.msra.mxu0 %v4332_v50  ;;  %v4387_v50 = vld [vmem:[#allocation5 + $0x560] ss:$20 sps:$4 sm:$0xff]  }
  0xcc   :  { %1618 = vmatprep.subr.bf16.mxu0 %v4340_v51  ;;  %v4405_v51 = vld [vmem:[#allocation8 + $0x50] ss:$20 sps:$4 sm:$0xff]  }
  0xcd   :  { %1642 = vmatpush1.bf16.msra.mxu1 %v4335_v52  ;;  %v4410_v52 = vld [vmem:[#allocation8 + $0x2c] ss:$20 sps:$4 sm:$0xff]  }
  0xce   :  { %1643 = vmatprep.subr.bf16.mxu1 %v4343_v54  ;;  %v4388_v54 = vld [vmem:[#allocation5 + $0x538] ss:$20 sps:$4 sm:$0xff]  }
  0xcf   :  { %1619 = vmatpush2.bf16.msra.mxu0 %v4338_v55  ;;  %v4408_v55 = vld [vmem:[#allocation8 + $0x28] ss:$20 sps:$4 sm:$0xff]  }
  0xd0   :  { %1620 = vmatprep.subr.bf16.mxu0 %v4346_v56  ;;  %v4413_v56 = vld [vmem:[#allocation8 + $0x4] ss:$20 sps:$4 sm:$0xff]  }
  0xd1   :  { %1644 = vmatpush1.bf16.msra.mxu1 %v4341_v57  ;;  %v4389_v57 = vld [vmem:[#allocation5 + $0x510] ss:$20 sps:$4 sm:$0xff]  }
  0xd2   :  { %1645 = vmatprep.subr.bf16.mxu1 %v4349_v58  ;;  %v4440_v58 = vld [vmem:[#allocation8 + $0x39c] ss:$20 sps:$4 sm:$0xff]  }
  0xd3   :  { %1621 = vmatpush2.bf16.msra.mxu0 %v4344_v59  ;;  %v4411_v59 = vld [vmem:[#allocation8] ss:$20 sps:$4 sm:$0xff]  }
  0xd4   :  { %3952 = vmatprep.subr.bf16.mxu0 %v4350_v61  ;;  %v4416_v61 = vld [vmem:[#allocation8 + $0x25c] ss:$20 sps:$4 sm:$0xff]  }
  0xd5   :  { %1646 = vmatpush1.bf16.msra.mxu1 %v4347_v62  ;;  %v4438_v62 = vld [vmem:[#allocation8 + $0x398] ss:$20 sps:$4 sm:$0xff]  }
  0xd6   :  { %1623 = vmatmul.mubr.bf16.vlgmr.msra.gmra.mxu0 %v4861_v15  ;;  %3974 = vmatprep.subr.bf16.mxu1 %v4352_v0  ;;  %v4414_v0 = vld [vmem:[#allocation8 + $0x258] ss:$20 sps:$4 sm:$0xff]  }
  0xd7   :  { %3953 = vmatpush3.bf16.msra.mxu0 %v4351_v1  ;;  %1704 = vmatprep.mubr.bf16.mxu0 %v4848_v60  ;;  %v4366_v60 = vld [vmem:[#allocation5 + $0x1c8] ss:$20 sps:$4 sm:$0xff]  }
  0xd8   :  { %1664 = vmatmul.mubr.bf16.vlgmr.msra.gmra.mxu1 %v4871_v53  ;;  %3954 = vmatprep.subr.bf16.mxu0 %v4354_v2  ;;  %v4419_v1 = vld [vmem:[#allocation8 + $0x234] ss:$20 sps:$4 sm:$0xff]  }
  0xd9   :  { %3975 = vmatpush3.bf16.msra.mxu1 %v4353_v3  ;;  %1744 = vmatprep.mubr.bf16.mxu1 %v4853_v63  ;;  %v4370_v63 = vld [vmem:[#allocation5 + $0x1a0] ss:$20 sps:$4 sm:$0xff]   ;;  %v4443_v2 = vld [vmem:[#allocation8 + $0x374] ss:$20 sps:$4 sm:$0xff]  }
  0xda   :  { %3976 = vmatprep.subr.bf16.mxu1 %v4356_v4  ;;  %v4441_v3 = vld [vmem:[#allocation8 + $0x370] ss:$20 sps:$4 sm:$0xff]  }
  0xdb   :  { %3955 = vmatpush3.bf16.msra.mxu0 %v4355_v5  ;;  %v4417_v4 = vld [vmem:[#allocation8 + $0x230] ss:$20 sps:$4 sm:$0xff]   ;;  %v4422_v5 = vld [vmem:[#allocation8 + $0x20c] ss:$20 sps:$4 sm:$0xff]  }
  0xdc   :  { %3956 = vmatprep.subr.bf16.mxu0 %v4358_v6  ;;  %v4446_v6 = vld [vmem:[#allocation8 + $0x34c] ss:$20 sps:$4 sm:$0xff]  }
  0xdd   :  { %3977 = vmatpush3.bf16.msra.mxu1 %v4357_v7  ;;  %v4444_v7 = vld [vmem:[#allocation8 + $0x348] ss:$20 sps:$4 sm:$0xff]  }
  0xde   :  { %3978 = vmatprep.subr.bf16.mxu1 %v4360_v9  ;;  %v4425_v9 = vld [vmem:[#allocation8 + $0x1e4] ss:$20 sps:$4 sm:$0xff]  }
  0xdf   :  { %3957 = vmatpush3.bf16.msra.mxu0 %v4359_v8  ;;  %v4420_v8 = vld [vmem:[#allocation8 + $0x208] ss:$20 sps:$4 sm:$0xff]  }
  0xe0   :  { %3958 = vmatprep.subr.bf16.mxu0 %v4362_v12  ;;  %v4447_v12 = vld [vmem:[#allocation8 + $0x320] ss:$20 sps:$4 sm:$0xff]  }
  0xe1   :  { %3979 = vmatpush3.bf16.msra.mxu1 %v4361_v11  ;;  %v4449_v11 = vld [vmem:[#allocation8 + $0x324] ss:$20 sps:$4 sm:$0xff]  }
  0xe2   :  { %3980 = vmatprep.subr.bf16.mxu1 %v4364_v13  ;;  %v4423_v13 = vld [vmem:[#allocation8 + $0x1e0] ss:$20 sps:$4 sm:$0xff]  }
  0xe3   :  { %3959 = vmatpush3.bf16.msra.mxu0 %v4363_v14  ;;  %v4452_v14 = vld [vmem:[#allocation8 + $0x2fc] ss:$20 sps:$4 sm:$0xff]  }
  0xe4   :  { %3960 = vmatprep.subr.bf16.mxu0 %v4366_v60  ;;  %v4450_v60 = vld [vmem:[#allocation8 + $0x2f8] ss:$20 sps:$4 sm:$0xff]  }
  0xe5   :  { %3981 = vmatpush3.bf16.msra.mxu1 %v4365_v16  ;;  %v4426_v16 = vld [vmem:[#allocation8 + $0x1b8] ss:$20 sps:$4 sm:$0xff]  }
  0xe6   :  { %3982 = vmatprep.subr.bf16.mxu1 %v4368_v17  ;;  %v4431_v17 = vld [vmem:[#allocation8 + $0x194] ss:$20 sps:$4 sm:$0xff]  }
  0xe7   :  { %3961 = vmatpush3.bf16.msra.mxu0 %v4367_v18  ;;  %v4455_v18 = vld [vmem:[#allocation8 + $0x2d4] ss:$20 sps:$4 sm:$0xff]  }
  0xe8   :  { %3962 = vmatprep.subr.bf16.mxu0 %v4370_v63  ;;  %v4453_v63 = vld [vmem:[#allocation8 + $0x2d0] ss:$20 sps:$4 sm:$0xff]  }
  0xe9   :  { %3983 = vmatpush3.bf16.msra.mxu1 %v4369_v19  ;;  %v4429_v19 = vld [vmem:[#allocation8 + $0x190] ss:$20 sps:$4 sm:$0xff]  }
  0xea   :  { %3984 = vmatprep.subr.bf16.mxu1 %v4372_v21  ;;  %v4434_v21 = vld [vmem:[#allocation8 + $0x16c] ss:$20 sps:$4 sm:$0xff]  }
  0xeb   :  { %3963 = vmatpush3.bf16.msra.mxu0 %v4371_v22  ;;  %v4458_v22 = vld [vmem:[#allocation8 + $0x2ac] ss:$20 sps:$4 sm:$0xff]  }
  0xec   :  { %3964 = vmatprep.subr.bf16.mxu0 %v4374_v23  ;;  %v4456_v23 = vld [vmem:[#allocation8 + $0x2a8] ss:$20 sps:$4 sm:$0xff]  }
  0xed   :  { %3985 = vmatpush3.bf16.msra.mxu1 %v4373_v24  ;;  %v4432_v24 = vld [vmem:[#allocation8 + $0x168] ss:$20 sps:$4 sm:$0xff]  }
  0xee   :  { %3986 = vmatprep.subr.bf16.mxu1 %v4376_v26  ;;  %v4461_v26 = vld [vmem:[#allocation8 + $0x284] ss:$20 sps:$4 sm:$0xff]  }
  0xef   :  { %3965 = vmatpush3.bf16.msra.mxu0 %v4375_v25  ;;  %v4437_v25 = vld [vmem:[#allocation8 + $0x144] ss:$20 sps:$4 sm:$0xff]  }
  0xf0   :  { %3966 = vmatprep.subr.bf16.mxu0 %v4378_v28  ;;  %v4464_v28 = vld [vmem:[#allocation8 + $0x4dc] ss:$20 sps:$4 sm:$0xff]  }
  0xf1   :  { %3987 = vmatpush3.bf16.msra.mxu1 %v4377_v27  ;;  %v4459_v27 = vld [vmem:[#allocation8 + $0x280] ss:$20 sps:$4 sm:$0xff]  }
  0xf2   :  { %3988 = vmatprep.subr.bf16.mxu1 %v4380_v29  ;;  %v4435_v29 = vld [vmem:[#allocation8 + $0x140] ss:$20 sps:$4 sm:$0xff]  }
  0xf3   :  { %3967 = vmatpush3.bf16.msra.mxu0 %v4379_v30  ;;  %v4462_v30 = vld [vmem:[#allocation8 + $0x4d8] ss:$20 sps:$4 sm:$0xff]  }
  0xf4   :  { %4058 = vmatprep.subr.bf16.mxu0 %v4786_v35 }
  0xf5   :  { %3989 = vmatpush3.bf16.msra.mxu1 %v4381_v31  ;;  %v4467_v31 = vld [vmem:[#allocation8 + $0x4b4] ss:$20 sps:$4 sm:$0xff]  }
  0xf6   :  { %1705 = vmatmul.mubr.bf16.vlgmr.msra.gmra.mxu0 %v4857_v10  ;;  %3119 = vmatprep.subr.bf16.mxu1 %v4392_v32  ;;  %v4385_v10 = vld [vmem:[#allocation5 + $0x5b0] ss:$20 sps:$4 sm:$0xff]  }
  0xf7   :  { %4059 = vmatpush3.bf16.msra.mxu0 %v4382_v33  ;;  %4074 = vmatprep.mubr.msk.bf16.mxu0 %vm4787_vm0, %v4786_v35  ;;  %v4465_v33 = vld [vmem:[#allocation8 + $0x4b0] ss:$20 sps:$4 sm:$0xff]  }
  0xf8   :  { %1745 = vmatmul.mubr.bf16.vlgmr.msra.gmra.mxu1 %v4861_v15  ;;  %4060 = vmatprep.subr.bf16.mxu0 %v4786_v35  ;;  %v4386_v15 = vld [vmem:[#allocation5 + $0x588] ss:$20 sps:$4 sm:$0xff]  }
  0xf9   :  { %3120 = vmatpush1.bf16.msra.mxu1 %v4390_v34 }
  0xfa   :  { %3121 = vmatprep.subr.bf16.mxu1 %v4395_v36 }
  0xfb   :  { %4061 = vmatpush3.bf16.msra.mxu0 %v4383_v38  ;;  %v4470_v38 = vld [vmem:[#allocation8 + $0x48c] ss:$20 sps:$4 sm:$0xff]  }
  0xfc   :  { %4062 = vmatprep.subr.bf16.mxu0 %v4786_v35 }
  0xfd   :  { %3122 = vmatpush1.bf16.msra.mxu1 %v4393_v39 }
  0xfe   :  { %3123 = vmatprep.subr.bf16.mxu1 %v4398_v40 }
  0xff   :  { %4063 = vmatpush3.bf16.msra.mxu0 %v4384_v41  ;;  %v4468_v41 = vld [vmem:[#allocation8 + $0x488] ss:$20 sps:$4 sm:$0xff]  }
 0x100   :  { %4064 = vmatprep.subr.bf16.mxu0 %v4786_v35 }
 0x101   :  { %3124 = vmatpush1.bf16.msra.mxu1 %v4396_v42 }
 0x102   :  { %3125 = vmatprep.subr.bf16.mxu1 %v4401_v44  ;;  %v4473_v44 = vld [vmem:[#allocation8 + $0x464] ss:$20 sps:$4 sm:$0xff]  }
 0x103   :  { %4065 = vmatpush3.bf16.msra.mxu0 %v4385_v10 }
 0x104   :  { %4066 = vmatprep.subr.bf16.mxu0 %v4786_v35 }
 0x105   :  { %3126 = vmatpush1.bf16.msra.mxu1 %v4399_v45  ;;  %v4509_v45 = vld [vmem:[#allocation8 + $0x61c] ss:$20 sps:$4 sm:$0xff]  }
 0x106   :  { %3127 = vmatprep.subr.bf16.mxu1 %v4404_v46 }
 0x107   :  { %4067 = vmatpush3.bf16.msra.mxu0 %v4386_v15  ;;  %v4471_v15 = vld [vmem:[#allocation8 + $0x460] ss:$20 sps:$4 sm:$0xff]  }
 0x108   :  { %4068 = vmatprep.subr.bf16.mxu0 %v4786_v35 }
 0x109   :  { %3128 = vmatpush1.bf16.msra.mxu1 %v4402_v47  ;;  %v4476_v47 = vld [vmem:[#allocation8 + $0x43c] ss:$20 sps:$4 sm:$0xff]  }
 0x10a   :  { %3129 = vmatprep.subr.bf16.mxu1 %v4407_v49  ;;  %v4474_v49 = vld [vmem:[#allocation8 + $0x438] ss:$20 sps:$4 sm:$0xff]  }
 0x10b   :  { %4069 = vmatpush3.bf16.msra.mxu0 %v4387_v50  ;;  %v4479_v50 = vld [vmem:[#allocation8 + $0x414] ss:$20 sps:$4 sm:$0xff]  }
 0x10c   :  { %4070 = vmatprep.subr.bf16.mxu0 %v4786_v35 }
 0x10d   :  { %3130 = vmatpush1.bf16.msra.mxu1 %v4405_v51  ;;  %v4477_v51 = vld [vmem:[#allocation8 + $0x410] ss:$20 sps:$4 sm:$0xff]  }
 0x10e   :  { %3131 = vmatprep.subr.bf16.mxu1 %v4410_v52  ;;  %v4482_v52 = vld [vmem:[#allocation8 + $0x3ec] ss:$20 sps:$4 sm:$0xff]  }
 0x10f   :  { %4071 = vmatpush3.bf16.msra.mxu0 %v4388_v54  ;;  %v1403_v54 = vsub.s32 0, %v4838_v43 }
 0x110   :  { %4072 = vmatprep.subr.bf16.mxu0 %v4786_v35 }
 0x111   :  { %3132 = vmatpush1.bf16.msra.mxu1 %v4408_v55  ;;  %v4895_v55 = vld [vmem:[#allocation7] sm:$0x1f] }
 0x112   :  { %3133 = vmatprep.subr.bf16.mxu1 %v4413_v56  ;;  %v1407_v56 = vsub.s32 1, %v4838_v43 }
 0x113   :  { %4073 = vmatpush3.bf16.msra.mxu0 %v4389_v57  ;;  %v4480_v57 = vld [vmem:[#allocation8 + $0x3e8] ss:$20 sps:$4 sm:$0xff]  }
 0x114   :  { %3160 = vmatprep.subr.bf16.mxu0 %v4440_v58  ;;  %v4485_v58 = vld [vmem:[#allocation8 + $0x3c4] ss:$20 sps:$4 sm:$0xff]  }
 0x115   :  { %3134 = vmatpush1.bf16.msra.mxu1 %v4411_v59  ;;  %v1404_v59 = vrot.slane %v4895_v55, %v1403_v54 }
 0x116   :  { %4075 = vmatmul.mubr.bf16.vlgmr.msra.gmra.mxu0 %v4871_v53  ;;  %3135 = vmatprep.subr.bf16.mxu1 %v4416_v61  ;;  %v4428_v53 = vld [vmem:[#allocation8 + $0x1bc] ss:$20 sps:$4 sm:$0xff]   ;;  %v1408_v61 = vrot.slane %v4895_v55, %v1407_v56 }
 0x117   :  { %3161 = vmatpush1.bf16.msra.mxu0 %v4438_v62  ;;  %v4483_v62 = vld [vmem:[#allocation8 + $0x3c0] ss:$20 sps:$4 sm:$0xff]  }
 0x118   :  { %3162 = vmatprep.subr.bf16.mxu0 %v4443_v2 }
 0x119   :  { %3136 = vmatpush2.bf16.msra.mxu1 %v4414_v0  ;;  %v4488_v0 = vld [vmem:[#allocation8 + $0x124] ss:$20 sps:$4 sm:$0xff]  }
 0x11a   :  { %3137 = vmatprep.subr.bf16.mxu1 %v4419_v1 }
 0x11b   :  { %3163 = vmatpush1.bf16.msra.mxu0 %v4441_v3 }
 0x11c   :  { %3164 = vmatprep.subr.bf16.mxu0 %v4446_v6 }
 0x11d   :  { %3138 = vmatpush2.bf16.msra.mxu1 %v4417_v4 }
 0x11e   :  { %3139 = vmatprep.subr.bf16.mxu1 %v4422_v5 }
 0x11f   :  { %3165 = vmatpush1.bf16.msra.mxu0 %v4444_v7 }
 0x120   :  { %3166 = vmatprep.subr.bf16.mxu0 %v4449_v11 }
 0x121   :  { %3140 = vmatpush2.bf16.msra.mxu1 %v4420_v8 }
 0x122   :  { %3141 = vmatprep.subr.bf16.mxu1 %v4425_v9 }
 0x123   :  { %3167 = vmatpush1.bf16.msra.mxu0 %v4447_v12 }
 0x124   :  { %3168 = vmatprep.subr.bf16.mxu0 %v4452_v14 }
 0x125   :  { %3142 = vmatpush2.bf16.msra.mxu1 %v4423_v13 }
 0x126   :  { %3143 = vmatprep.subr.bf16.mxu1 %v4428_v53 }
 0x127   :  { %3169 = vmatpush1.bf16.msra.mxu0 %v4450_v60 }
 0x128   :  { %3170 = vmatprep.subr.bf16.mxu0 %v4455_v18  ;;  %v4515_v18 = vld [vmem:[#allocation8 + $0x5f4] ss:$20 sps:$4 sm:$0xff]  }
 0x129   :  { %3144 = vmatpush2.bf16.msra.mxu1 %v4426_v16  ;;  %v4507_v16 = vld [vmem:[#allocation8 + $0x618] ss:$20 sps:$4 sm:$0xff]  }
 0x12a   :  { %3145 = vmatprep.subr.bf16.mxu1 %v4431_v17 }
 0x12b   :  { %3171 = vmatpush1.bf16.msra.mxu0 %v4453_v63  ;;  %v4513_v63 = vld [vmem:[#allocation8 + $0x5f0] ss:$20 sps:$4 sm:$0xff]  }
 0x12c   :  { %3172 = vmatprep.subr.bf16.mxu0 %v4458_v22  ;;  %v4527_v22 = vld [vmem:[#allocation8 + $0x5a4] ss:$20 sps:$4 sm:$0xff]  }
 0x12d   :  { %3146 = vmatpush2.bf16.msra.mxu1 %v4429_v19  ;;  %v4521_v19 = vld [vmem:[#allocation8 + $0x5cc] ss:$20 sps:$4 sm:$0xff]  }
 0x12e   :  { %3147 = vmatprep.subr.bf16.mxu1 %v4434_v21  ;;  %v4519_v21 = vld [vmem:[#allocation8 + $0x5c8] ss:$20 sps:$4 sm:$0xff]  }
 0x12f   :  { %3173 = vmatpush1.bf16.msra.mxu0 %v4456_v23  ;;  %v4525_v23 = vld [vmem:[#allocation8 + $0x5a0] ss:$20 sps:$4 sm:$0xff]  }
 0x130   :  { %3174 = vmatprep.subr.bf16.mxu0 %v4461_v26  ;;  %v4539_v26 = vld [vmem:[#allocation8 + $0x554] ss:$20 sps:$4 sm:$0xff]  }
 0x131   :  { %3148 = vmatpush2.bf16.msra.mxu1 %v4432_v24  ;;  %v4533_v24 = vld [vmem:[#allocation8 + $0x57c] ss:$20 sps:$4 sm:$0xff]  }
 0x132   :  { %3149 = vmatprep.subr.bf16.mxu1 %v4437_v25  ;;  %v4531_v25 = vld [vmem:[#allocation8 + $0x578] ss:$20 sps:$4 sm:$0xff]  }
 0x133   :  { %3175 = vmatpush1.bf16.msra.mxu0 %v4459_v27  ;;  %v4537_v27 = vld [vmem:[#allocation8 + $0x550] ss:$20 sps:$4 sm:$0xff]  }
 0x134   :  { %3176 = vmatprep.subr.bf16.mxu0 %v4464_v28  ;;  %v4545_v28 = vld [vmem:[#allocation8 + $0x52c] ss:$20 sps:$4 sm:$0xff]  }
 0x135   :  { %3150 = vmatpush2.bf16.msra.mxu1 %v4435_v29  ;;  %v4543_v29 = vld [vmem:[#allocation8 + $0x528] ss:$20 sps:$4 sm:$0xff]  }
 0x136   :  { %v1460_v32 = vpop.f32.mrf.mxu0  ;;  %3201 = vmatprep.subr.bf16.mxu1 %v4509_v45 }
 0x137   :  { %3177 = vmatpush2.bf16.msra.mxu0 %v4462_v30  ;;  %v1461_v1 = vadd.f32 %v1460_v32, %v1404_v59  ;;  %v4551_v30 = vld [vmem:[#allocation8 + $0x504] ss:$20 sps:$4 sm:$0xff]  }
 0x138   :  { %v1462_v34 = vpop.f32.mrf.mxu0  ;;  %v1501_v36 = vpop.f32.mrf.mxu1  ;;  %3178 = vmatprep.subr.bf16.mxu0 %v4467_v31 }
 0x139   :  { %v1463_v2 = vadd.f32 %v1462_v34, %v1408_v61  ;;  %v1502_v3 = vadd.f32 %v1501_v36, %v1461_v1  ;;  %v4557_v34 = vld [vmem:[#allocation8 + $0x3a4] ss:$20 sps:$4 sm:$0xff]  }
 0x13a   :  { %v1464_v39 = vpop.f32.mrf.mxu0  ;;  %v1503_v40 = vpop.f32.mrf.mxu1 }
 0x13b   :  { %3179 = vmatpush2.bf16.msra.mxu0 %v4465_v33  ;;  %v1504_v5 = vadd.f32 %v1503_v40, %v1463_v2  ;;  %v4549_v33 = vld [vmem:[#allocation8 + $0x500] ss:$20 sps:$4 sm:$0xff]   ;;  %v1411_v39 = vsub.s32 2, %v4838_v43  ;;  %v1415_v40 = vsub.s32 3, %v4838_v43 }
 0x13c   :  { %v1465_v42 = vpop.f32.mrf.mxu0  ;;  %v1505_v10 = vpop.f32.mrf.mxu1  ;;  %3180 = vmatprep.subr.bf16.mxu0 %v4470_v38 }
 0x13d   :  { %v1416_v42 = vrot.slane %v4895_v55, %v1415_v40 }
 0x13e   :  { %v1506_v46 = vpop.f32.mrf.mxu1 }
 0x13f   :  { %3181 = vmatpush2.bf16.msra.mxu0 %v4468_v41  ;;  %v1412_v41 = vrot.slane %v4895_v55, %v1411_v39 }
 0x140   :  { %3182 = vmatprep.subr.bf16.mxu0 %v4473_v44 }
 0x143   :  { %3183 = vmatpush2.bf16.msra.mxu0 %v4471_v15 }
 0x144   :  { %3184 = vmatprep.subr.bf16.mxu0 %v4476_v47 }
 0x147   :  { %3185 = vmatpush2.bf16.msra.mxu0 %v4474_v49 }
 0x148   :  { %3186 = vmatprep.subr.bf16.mxu0 %v4479_v50 }
 0x14b   :  { %3187 = vmatpush2.bf16.msra.mxu0 %v4477_v51 }
 0x14c   :  { %3188 = vmatprep.subr.bf16.mxu0 %v4482_v52 }
 0x14f   :  { %3189 = vmatpush2.bf16.msra.mxu0 %v4480_v57 }
 0x150   :  { %3190 = vmatprep.subr.bf16.mxu0 %v4485_v58 }
 0x153   :  { %3191 = vmatpush2.bf16.msra.mxu0 %v4483_v62 }
 0x154   :  { %3242 = vmatprep.subr.bf16.mxu0 %v4488_v0 }
 0x156   :  { %v1542_v4 = vpop.f32.mrf.mxu0 }
 0x157   :  { %v1543_v6 = vadd.f32 %v1542_v4, %v1502_v3  ;;  %v4486_v4 = vld [vmem:[#allocation8 + $0x120] ss:$20 sps:$4 sm:$0xff]  }
 0x158   :  { %v1544_v7 = vpop.f32.mrf.mxu0 }
 0x159   :  { %vm1792_vm1 = vcmp.gt.f32.partialorder %v1543_v6, 0.0  ;;  %v1797_v8 = vmul.f32 0.01, %v1543_v6  ;;  %v1545_v9 = vadd.f32 %v1544_v7, %v1504_v5  ;;  %v4489_v7 = vld [vmem:[#allocation8 + $0xf8] ss:$20 sps:$4 sm:$0xff]  }
 0x15a   :  { %v1546_v11 = vpop.f32.mrf.mxu0 }
 0x15b   :  { %vm1793_vm2 = vcmp.gt.f32.partialorder %v1545_v9, 0.0  ;;  %v1798_v12 = vmul.f32 0.01, %v1545_v9  ;;  %v1802_v13 = vsel %vm1792_vm1, %v1543_v6, %v1797_v8  ;;  %v4491_v6 = vld [vmem:[#allocation8 + $0xfc] ss:$20 sps:$4 sm:$0xff]  }
 0x15c   :  { %v1547_v53 = vpop.f32.mrf.mxu0  ;;  %v4906_v17 = vpack.c.bf16 %v1802_v13, %v1802_v13  ;;  %v4494_v8 = vld [vmem:[#allocation8 + $0xd4] ss:$20 sps:$4 sm:$0xff]   ;;  %v4497_v11 = vld [vmem:[#allocation8 + $0xac] ss:$20 sps:$4 sm:$0xff]   ;;  %v4500_v13 = vld [vmem:[#allocation8 + $0x84] ss:$20 sps:$4 sm:$0xff]  }
 0x15d   :  { %v1803_v14 = vsel %vm1793_vm2, %v1545_v9, %v1798_v12  ;;  %v4492_v9 = vld [vmem:[#allocation8 + $0xd0] ss:$20 sps:$4 sm:$0xff]   ;;  %v4495_v12 = vld [vmem:[#allocation8 + $0xa8] ss:$20 sps:$4 sm:$0xff]   ;;  %v4498_v53 = vld [vmem:[#allocation8 + $0x80] ss:$20 sps:$4 sm:$0xff]  }
 0x15e   :  { %v4904_v60 = vpack.c.bf16 %v1803_v14, %v1803_v14  ;;  %v4503_v14 = vld [vmem:[#allocation8 + $0x5c] ss:$20 sps:$4 sm:$0xff]  }
 0x160   :  { %3151 = vmatprep.mubr.bf16.mxu1 %v4904_v60 }
 0x161   :  { %3152 = vmatmul.mubr.bf16.vlgmr.msra.gmra.mxu1 %v4906_v17 }
 0x162   :  { %3202 = vmatpush1.bf16.msra.mxu1 %v4507_v16  ;;  %3233 = vmatprep.mubr.bf16.mxu1 %v4785_v20  ;;  %v4501_v16 = vld [vmem:[#allocation8 + $0x58] ss:$20 sps:$4 sm:$0xff]  }
 0x163   :  { %3203 = vmatprep.subr.bf16.mxu1 %v4515_v18  ;;  %v4506_v18 = vld [vmem:[#allocation8 + $0x34] ss:$20 sps:$4 sm:$0xff]  }
 0x166   :  { %3204 = vmatpush1.bf16.msra.mxu1 %v4513_v63 }
 0x167   :  { %3205 = vmatprep.subr.bf16.mxu1 %v4521_v19 }
 0x16a   :  { %3206 = vmatpush1.bf16.msra.mxu1 %v4519_v21 }
 0x16b   :  { %3207 = vmatprep.subr.bf16.mxu1 %v4527_v22  ;;  %v4504_v22 = vld [vmem:[#allocation8 + $0x30] ss:$20 sps:$4 sm:$0xff]  }
 0x16e   :  { %3208 = vmatpush1.bf16.msra.mxu1 %v4525_v23  ;;  %v4512_v23 = vld [vmem:[#allocation8 + $0xc] ss:$20 sps:$4 sm:$0xff]  }
 0x16f   :  { %3209 = vmatprep.subr.bf16.mxu1 %v4533_v24 }
 0x172   :  { %3210 = vmatpush1.bf16.msra.mxu1 %v4531_v25 }
 0x173   :  { %3211 = vmatprep.subr.bf16.mxu1 %v4539_v26 }
 0x176   :  { %3212 = vmatpush1.bf16.msra.mxu1 %v4537_v27  ;;  %v4510_v27 = vld [vmem:[#allocation8 + $0x8] ss:$20 sps:$4 sm:$0xff]  }
 0x177   :  { %3213 = vmatprep.subr.bf16.mxu1 %v4545_v28 }
 0x178   :  { %v1583_v31 = vpop.f32.mrf.mxu1 }
 0x179   :  { %v1584_v10 = vadd.f32 %v1583_v31, %v1412_v41  ;;  %v4516_v31 = vld [vmem:[#allocation8 + $0x260] ss:$20 sps:$4 sm:$0xff]  }
 0x17a   :  { %v1585_v32 = vpop.f32.mrf.mxu1  ;;  %3214 = vmatpush1.bf16.msra.mxu1 %v4543_v29  ;;  %v4518_v29 = vld [vmem:[#allocation8 + $0x264] ss:$20 sps:$4 sm:$0xff]   ;;  %v4536_v41 = vld [vmem:[#allocation8 + $0x1ec] ss:$20 sps:$4 sm:$0xff]  }
 0x17b   :  { %3215 = vmatprep.subr.bf16.mxu1 %v4551_v30  ;;  %v1586_v45 = vadd.f32 %v1585_v32, %v1416_v42  ;;  %v4524_v32 = vld [vmem:[#allocation8 + $0x23c] ss:$20 sps:$4 sm:$0xff]  }
 0x17c   :  { %v1587_v36 = vpop.f32.mrf.mxu1  ;;  %v4534_v42 = vld [vmem:[#allocation8 + $0x1e8] ss:$20 sps:$4 sm:$0xff]  }
 0x17d   :  { %v4528_v36 = vld [vmem:[#allocation8 + $0x210] ss:$20 sps:$4 sm:$0xff]  }
 0x17e   :  { %v1588_v38 = vpop.f32.mrf.mxu1  ;;  %3216 = vmatpush1.bf16.msra.mxu1 %v4549_v33  ;;  %v4522_v33 = vld [vmem:[#allocation8 + $0x238] ss:$20 sps:$4 sm:$0xff]  }
 0x17f   :  { %3283 = vmatprep.subr.bf16.mxu1 %v4557_v34  ;;  %v4530_v34 = vld [vmem:[#allocation8 + $0x214] ss:$20 sps:$4 sm:$0xff]   ;;  %v1419_v38 = vsub.s32 4, %v4838_v43 }
 0x196   :  { %v1624_v44 = vpop.f32.mrf.mxu0 }
 0x197   :  { %v1625_v46 = vadd.f32 %v1624_v44, %v1584_v10  ;;  %v1420_v10 = vrot.slane %v4895_v55, %v1419_v38 }
 0x198   :  { %v1626_v15 = vpop.f32.mrf.mxu0  ;;  %v1665_v47 = vpop.f32.mrf.mxu1 }
 0x199   :  { %v1627_v49 = vadd.f32 %v1626_v15, %v1586_v45  ;;  %v1666_v50 = vadd.f32 %v1665_v47, %v1625_v46  ;;  %v4542_v45 = vld [vmem:[#allocation8 + $0x1c4] ss:$20 sps:$4 sm:$0xff]   ;;  %v4540_v46 = vld [vmem:[#allocation8 + $0x1c0] ss:$20 sps:$4 sm:$0xff]  }
 0x19a   :  { %v1628_v51 = vpop.f32.mrf.mxu0  ;;  %v1667_v52 = vpop.f32.mrf.mxu1 }
 0x19b   :  { %vm1794_vm3 = vcmp.gt.f32.partialorder %v1666_v50, 0.0  ;;  %v1799_v57 = vmul.f32 0.01, %v1666_v50  ;;  %v1668_v58 = vadd.f32 %v1667_v52, %v1627_v49  ;;  %v4548_v49 = vld [vmem:[#allocation8 + $0x19c] ss:$20 sps:$4 sm:$0xff]  }
 0x19c   :  { %v1629_v59 = vpop.f32.mrf.mxu0  ;;  %v1669_v61 = vpop.f32.mrf.mxu1  ;;  %v4554_v52 = vld [vmem:[#allocation8 + $0x174] ss:$20 sps:$4 sm:$0xff]  }
 0x19d   :  { %vm1795_vm4 = vcmp.gt.f32.partialorder %v1668_v58, 0.0  ;;  %v1800_v62 = vmul.f32 0.01, %v1668_v58  ;;  %v1804_v0 = vsel %vm1794_vm3, %v1666_v50, %v1799_v57  ;;  %v4546_v50 = vld [vmem:[#allocation8 + $0x198] ss:$20 sps:$4 sm:$0xff]  }
 0x19e   :  { %v1670_v1 = vpop.f32.mrf.mxu1  ;;  %v4921_v5 = vpack.c.bf16 %v1804_v0, %v1804_v0  ;;  %v4552_v61 = vld [vmem:[#allocation8 + $0x170] ss:$20 sps:$4 sm:$0xff]  }
 0x19f   :  { %v1805_v2 = vsel %vm1795_vm4, %v1668_v58, %v1800_v62  ;;  %v4560_v62 = vld [vmem:[#allocation8 + $0x14c] ss:$20 sps:$4 sm:$0xff]  }
 0x1a0   :  { %v4919_v3 = vpack.c.bf16 %v1805_v2, %v1805_v2  ;;  %v4555_v2 = vld [vmem:[#allocation8 + $0x3a0] ss:$20 sps:$4 sm:$0xff]  }
 0x1a2   :  { %3192 = vmatprep.mubr.bf16.mxu0 %v4919_v3 }
 0x1a3   :  { %3193 = vmatmul.mubr.bf16.vlgmr.msra.gmra.mxu0 %v4921_v5 }
 0x1a4   :  { %3243 = vmatpush1.bf16.msra.mxu0 %v4486_v4  ;;  %3274 = vmatprep.mubr.bf16.mxu0 %v4904_v60 }
 0x1a5   :  { %3244 = vmatprep.subr.bf16.mxu0 %v4491_v6 }
 0x1a8   :  { %3245 = vmatpush1.bf16.msra.mxu0 %v4489_v7  ;;  %v4558_v7 = vld [vmem:[#allocation8 + $0x148] ss:$20 sps:$4 sm:$0xff]  }
 0x1a9   :  { %3246 = vmatprep.subr.bf16.mxu0 %v4494_v8  ;;  %v4563_v8 = vld [vmem:[#allocation8 + $0x37c] ss:$20 sps:$4 sm:$0xff]  }
 0x1ac   :  { %3247 = vmatpush1.bf16.msra.mxu0 %v4492_v9  ;;  %v4566_v9 = vld [vmem:[#allocation8 + $0x624] ss:$20 sps:$4 sm:$0xff]  }
 0x1ad   :  { %3248 = vmatprep.subr.bf16.mxu0 %v4497_v11  ;;  %v4561_v11 = vld [vmem:[#allocation8 + $0x378] ss:$20 sps:$4 sm:$0xff]  }
 0x1b0   :  { %3249 = vmatpush1.bf16.msra.mxu0 %v4495_v12  ;;  %v4564_v12 = vld [vmem:[#allocation8 + $0x620] ss:$20 sps:$4 sm:$0xff]  }
 0x1b1   :  { %3250 = vmatprep.subr.bf16.mxu0 %v4500_v13  ;;  %v4569_v13 = vld [vmem:[#allocation8 + $0x354] ss:$20 sps:$4 sm:$0xff]  }
 0x1b4   :  { %3251 = vmatpush1.bf16.msra.mxu0 %v4498_v53  ;;  %v4572_v53 = vld [vmem:[#allocation8 + $0x5fc] ss:$20 sps:$4 sm:$0xff]  }
 0x1b5   :  { %3252 = vmatprep.subr.bf16.mxu0 %v4503_v14  ;;  %v4567_v14 = vld [vmem:[#allocation8 + $0x350] ss:$20 sps:$4 sm:$0xff]  }
 0x1b6   :  { %v3968_v63 = vpop.f32.mrf.mxu0 }
 0x1b8   :  { %3253 = vmatpush1.bf16.msra.mxu0 %v4501_v16  ;;  %v3969_v19 = vpop.f32.mrf.mxu0  ;;  %v3990_v21 = vpop.f32.mrf.mxu1  ;;  %v4570_v16 = vld [vmem:[#allocation8 + $0x5f8] ss:$20 sps:$4 sm:$0xff]  }
 0x1b9   :  { %3254 = vmatprep.subr.bf16.mxu0 %v4506_v18  ;;  %v3970_v44 = vadd.f32 %v3969_v19, %v3968_v63  ;;  %v4575_v18 = vld [vmem:[#allocation8 + $0x32c] ss:$20 sps:$4 sm:$0xff]   ;;  %v4578_v63 = vld [vmem:[#allocation8 + $0x5d4] ss:$20 sps:$4 sm:$0xff]  }
 0x1ba   :  { %v3971_v24 = vpop.f32.mrf.mxu0  ;;  %v3991_v25 = vpop.f32.mrf.mxu1  ;;  %v4573_v19 = vld [vmem:[#allocation8 + $0x328] ss:$20 sps:$4 sm:$0xff]  }
 0x1bb   :  { %v1707_v15 = vadd.f32 %v3970_v44, %v1420_v10  ;;  %v3992_v47 = vadd.f32 %v3991_v25, %v3990_v21  ;;  %v4576_v21 = vld [vmem:[#allocation8 + $0x5d0] ss:$20 sps:$4 sm:$0xff]   ;;  %v4579_v24 = vld [vmem:[#allocation8 + $0x300] ss:$20 sps:$4 sm:$0xff]   ;;  %v4582_v25 = vld [vmem:[#allocation8 + $0x5a8] ss:$20 sps:$4 sm:$0xff]  }
 0x1bc   :  { %3255 = vmatpush1.bf16.msra.mxu0 %v4504_v22  ;;  %v3972_v26 = vpop.f32.mrf.mxu0  ;;  %v3993_v28 = vpop.f32.mrf.mxu1  ;;  %v4581_v22 = vld [vmem:[#allocation8 + $0x304] ss:$20 sps:$4 sm:$0xff]   ;;  %v4608_v10 = vld [vmem:[#allocation8 + $0x50c] ss:$20 sps:$4 sm:$0xff]  }
 0x1bd   :  { %3256 = vmatprep.subr.bf16.mxu0 %v4512_v23  ;;  %v1747_v51 = vadd.f32 %v3992_v47, %v1707_v15  ;;  %v4584_v23 = vld [vmem:[#allocation8 + $0x5ac] ss:$20 sps:$4 sm:$0xff]   ;;  %v4587_v26 = vld [vmem:[#allocation8 + $0x2dc] ss:$20 sps:$4 sm:$0xff]  }
 0x1be   :  { %v3994_v30 = vpop.f32.mrf.mxu1  ;;  %v4585_v28 = vld [vmem:[#allocation8 + $0x2d8] ss:$20 sps:$4 sm:$0xff]   ;;  %v4603_v44 = vld [vmem:[#allocation8 + $0x4e0] ss:$20 sps:$4 sm:$0xff]   ;;  %v4612_v15 = vld [vmem:[#allocation8 + $0x4e8] ss:$20 sps:$4 sm:$0xff]  }
 0x1bf   :  { %v4596_v30 = vld [vmem:[#allocation8 + $0x55c] ss:$20 sps:$4 sm:$0xff]   ;;  %v4609_v47 = vld [vmem:[#allocation8 + $0x4b8] ss:$20 sps:$4 sm:$0xff]  }
 0x1c0   :  { %3257 = vmatpush1.bf16.msra.mxu0 %v4510_v27  ;;  %v4590_v27 = vld [vmem:[#allocation8 + $0x584] ss:$20 sps:$4 sm:$0xff]  }
 0x1c1   :  { %3258 = vmatprep.subr.bf16.mxu0 %v4518_v29  ;;  %v4593_v29 = vld [vmem:[#allocation8 + $0x2b4] ss:$20 sps:$4 sm:$0xff]  }
 0x1c4   :  { %3259 = vmatpush2.bf16.msra.mxu0 %v4516_v31  ;;  %v4591_v31 = vld [vmem:[#allocation8 + $0x2b0] ss:$20 sps:$4 sm:$0xff]  }
 0x1c5   :  { %3260 = vmatprep.subr.bf16.mxu0 %v4524_v32  ;;  %v4594_v32 = vld [vmem:[#allocation8 + $0x558] ss:$20 sps:$4 sm:$0xff]  }
 0x1c8   :  { %3261 = vmatpush2.bf16.msra.mxu0 %v4522_v33  ;;  %v4599_v33 = vld [vmem:[#allocation8 + $0x28c] ss:$20 sps:$4 sm:$0xff]  }
 0x1c9   :  { %3262 = vmatprep.subr.bf16.mxu0 %v4530_v34  ;;  %v4602_v34 = vld [vmem:[#allocation8 + $0x534] ss:$20 sps:$4 sm:$0xff]  }
 0x1cc   :  { %3263 = vmatpush2.bf16.msra.mxu0 %v4528_v36  ;;  %v4597_v36 = vld [vmem:[#allocation8 + $0x288] ss:$20 sps:$4 sm:$0xff]  }
 0x1cd   :  { %3264 = vmatprep.subr.bf16.mxu0 %v4536_v41  ;;  %v4600_v41 = vld [vmem:[#allocation8 + $0x530] ss:$20 sps:$4 sm:$0xff]  }
 0x1d0   :  { %3265 = vmatpush2.bf16.msra.mxu0 %v4534_v42  ;;  %v4605_v42 = vld [vmem:[#allocation8 + $0x4e4] ss:$20 sps:$4 sm:$0xff]  }
 0x1d1   :  { %3266 = vmatprep.subr.bf16.mxu0 %v4542_v45  ;;  %v4606_v45 = vld [vmem:[#allocation8 + $0x508] ss:$20 sps:$4 sm:$0xff]  }
 0x1d4   :  { %3267 = vmatpush2.bf16.msra.mxu0 %v4540_v46  ;;  %v4611_v46 = vld [vmem:[#allocation8 + $0x4bc] ss:$20 sps:$4 sm:$0xff]  }
 0x1d5   :  { %3268 = vmatprep.subr.bf16.mxu0 %v4548_v49  ;;  %v4613_v49 = vld [vmem:[#allocation8 + $0x3a8] ss:$20 sps:$4 sm:$0xff]  }
 0x1d6   :  { %v1786_v57 = vpop.f32.mrf.mxu0 }
 0x1d7   :  { %v1787_v58 = vadd.f32 %v1786_v57, %v1747_v51  ;;  %v4617_v51 = vld [vmem:[#allocation8 + $0x4c0] ss:$20 sps:$4 sm:$0xff]  }
 0x1d8   :  { %3269 = vmatpush2.bf16.msra.mxu0 %v4546_v50  ;;  %v4076_v59 = vpop.f32.mrf.mxu0  ;;  %v4616_v50 = vld [vmem:[#allocation8 + $0x494] ss:$20 sps:$4 sm:$0xff]  }
 0x1d9   :  { %vm1796_vm5 = vcmp.gt.f32.partialorder %v1787_v58, 0.0  ;;  %v1801_v55 = vmul.f32 0.01, %v1787_v58  ;;  %3270 = vmatprep.subr.bf16.mxu0 %v4554_v52  ;;  %v4614_v52 = vld [vmem:[#allocation8 + $0x490] ss:$20 sps:$4 sm:$0xff]  }
 0x1da   :  { %v1789_v0 = vpop.f32.mrf.mxu0  ;;  %v4618_v57 = vld [vmem:[#allocation8 + $0x380] ss:$20 sps:$4 sm:$0xff]   ;;  %v4622_v59 = vld [vmem:[#allocation8 + $0x498] ss:$20 sps:$4 sm:$0xff]  }
 0x1db   :  { %v1806_v1 = vsel %vm1796_vm5, %v1787_v58, %v1801_v55  ;;  %v4621_v58 = vld [vmem:[#allocation8 + $0x46c] ss:$20 sps:$4 sm:$0xff]   ;;  %v4627_v0 = vld [vmem:[#allocation8 + $0x470] ss:$20 sps:$4 sm:$0xff]  }
 0x1dc   :  { %v4930_v4 = vpack.c.bf16 %v1806_v1, %v1806_v1  ;;  %3271 = vmatpush2.bf16.msra.mxu0 %v4552_v61  ;;  %v4077_v6 = vpop.f32.mrf.mxu0  ;;  %v4619_v61 = vld [vmem:[#allocation8 + $0x468] ss:$20 sps:$4 sm:$0xff]   ;;  %v4623_v55 = vld [vmem:[#allocation8 + $0x358] ss:$20 sps:$4 sm:$0xff]   ;;  %v4624_v1 = vld [vmem:[#allocation8 + $0x440] ss:$20 sps:$4 sm:$0xff]  }
 0x1dd   :  { %3272 = vmatprep.subr.bf16.mxu0 %v4560_v62  ;;  %v4626_v62 = vld [vmem:[#allocation8 + $0x444] ss:$20 sps:$4 sm:$0xff]   ;;  %v4631_v6 = vld [vmem:[#allocation8 + $0x41c] ss:$20 sps:$4 sm:$0xff]  }
 0x1de   :  { %3234 = vmatmul.mubr.bf16.vlgmr.msra.gmra.mxu1 %v4930_v4 }
 0x1df   :  { %3284 = vmatpush1.bf16.msra.mxu1 %v4555_v2  ;;  %3315 = vmatprep.mubr.bf16.mxu1 %v4919_v3  ;;  %v4628_v2 = vld [vmem:[#allocation8 + $0x330] ss:$20 sps:$4 sm:$0xff]  }
 0x1e0   :  { %3273 = vmatpush2.bf16.msra.mxu0 %v4558_v7  ;;  %3285 = vmatprep.subr.bf16.mxu1 %v4563_v8  ;;  %v4629_v7 = vld [vmem:[#allocation8 + $0x418] ss:$20 sps:$4 sm:$0xff]   ;;  %v4633_v8 = vld [vmem:[#allocation8 + $0x308] ss:$20 sps:$4 sm:$0xff]  }
 0x1e1   :  { %3324 = vmatprep.subr.bf16.mxu0 %v4566_v9  ;;  %v4636_v9 = vld [vmem:[#allocation8 + $0x3f4] ss:$20 sps:$4 sm:$0xff]  }
 0x1e3   :  { %3275 = vmatmul.mubr.bf16.vlgmr.msra.gmra.mxu0 %v4906_v17  ;;  %3286 = vmatpush1.bf16.msra.mxu1 %v4561_v11  ;;  %v4637_v11 = vld [vmem:[#allocation8 + $0x420] ss:$20 sps:$4 sm:$0xff]  }
 0x1e4   :  { %3325 = vmatpush1.bf16.msra.mxu0 %v4564_v12  ;;  %3287 = vmatprep.subr.bf16.mxu1 %v4569_v13  ;;  %v4634_v12 = vld [vmem:[#allocation8 + $0x3f0] ss:$20 sps:$4 sm:$0xff]   ;;  %v4638_v13 = vld [vmem:[#allocation8 + $0x2e0] ss:$20 sps:$4 sm:$0xff]  }
 0x1e5   :  { %3326 = vmatprep.subr.bf16.mxu0 %v4572_v53  ;;  %3356 = vmatprep.mubr.bf16.mxu0 %v4785_v20  ;;  %v4588_v20 = vld [vmem:[#allocation8 + $0x580] ss:$20 sps:$4 sm:$0xff]  }
 0x1e6   :  { %v4641_v53 = vld [vmem:[#allocation8 + $0x3cc] ss:$20 sps:$4 sm:$0xff]  }
 0x1e7   :  { %3288 = vmatpush1.bf16.msra.mxu1 %v4567_v14  ;;  %v4642_v14 = vld [vmem:[#allocation8 + $0x3f8] ss:$20 sps:$4 sm:$0xff]  }
 0x1e8   :  { %3327 = vmatpush1.bf16.msra.mxu0 %v4570_v16  ;;  %3289 = vmatprep.subr.bf16.mxu1 %v4575_v18  ;;  %v4639_v16 = vld [vmem:[#allocation8 + $0x3c8] ss:$20 sps:$4 sm:$0xff]   ;;  %v4643_v18 = vld [vmem:[#allocation8 + $0x2b8] ss:$20 sps:$4 sm:$0xff]  }
 0x1e9   :  { %3328 = vmatprep.subr.bf16.mxu0 %v4578_v63  ;;  %v4644_v63 = vld [vmem:[#allocation8 + $0x268] ss:$20 sps:$4 sm:$0xff]  }
 0x1eb   :  { %3290 = vmatpush1.bf16.msra.mxu1 %v4573_v19  ;;  %v4646_v19 = vld [vmem:[#allocation8 + $0x3d0] ss:$20 sps:$4 sm:$0xff]  }
 0x1ec   :  { %3329 = vmatpush1.bf16.msra.mxu0 %v4576_v21  ;;  %3291 = vmatprep.subr.bf16.mxu1 %v4581_v22  ;;  %v4645_v21 = vld [vmem:[#allocation8 + $0x128] ss:$20 sps:$4 sm:$0xff]   ;;  %v4647_v22 = vld [vmem:[#allocation8 + $0x290] ss:$20 sps:$4 sm:$0xff]  }
 0x1ed   :  { %3330 = vmatprep.subr.bf16.mxu0 %v4584_v23  ;;  %v4648_v23 = vld [vmem:[#allocation8 + $0x240] ss:$20 sps:$4 sm:$0xff]  }
 0x1ef   :  { %3292 = vmatpush1.bf16.msra.mxu1 %v4579_v24  ;;  %v4649_v24 = vld [vmem:[#allocation8 + $0x100] ss:$20 sps:$4 sm:$0xff]  }
 0x1f0   :  { %3331 = vmatpush1.bf16.msra.mxu0 %v4582_v25  ;;  %3293 = vmatprep.subr.bf16.mxu1 %v4587_v26  ;;  %v4650_v25 = vld [vmem:[#allocation8 + $0x218] ss:$20 sps:$4 sm:$0xff]  }
 0x1f1   :  { %3332 = vmatprep.subr.bf16.mxu0 %v4590_v27 }
 0x1f3   :  { %3294 = vmatpush1.bf16.msra.mxu1 %v4585_v28  ;;  %v4651_v28 = vld [vmem:[#allocation8 + $0xd8] ss:$20 sps:$4 sm:$0xff]  }
 0x1f4   :  { %3333 = vmatpush1.bf16.msra.mxu0 %v4588_v20  ;;  %3295 = vmatprep.subr.bf16.mxu1 %v4593_v29  ;;  %v4652_v20 = vld [vmem:[#allocation8 + $0x1f0] ss:$20 sps:$4 sm:$0xff]  }
 0x1f5   :  { %3334 = vmatprep.subr.bf16.mxu0 %v4596_v30 }
 0x1f7   :  { %3296 = vmatpush1.bf16.msra.mxu1 %v4591_v31  ;;  %v4653_v31 = vld [vmem:[#allocation8 + $0xb0] ss:$20 sps:$4 sm:$0xff]  }
 0x1f8   :  { %3335 = vmatpush1.bf16.msra.mxu0 %v4594_v32  ;;  %3297 = vmatprep.subr.bf16.mxu1 %v4599_v33  ;;  %v4654_v32 = vld [vmem:[#allocation8 + $0x1c8] ss:$20 sps:$4 sm:$0xff]   ;;  %v4656_v33 = vld [vmem:[#allocation8 + $0x1a0] ss:$20 sps:$4 sm:$0xff]  }
 0x1f9   :  { %3336 = vmatprep.subr.bf16.mxu0 %v4602_v34  ;;  %v4657_v34 = vld [vmem:[#allocation8 + $0x60] ss:$20 sps:$4 sm:$0xff]  }
 0x1fb   :  { %3298 = vmatpush1.bf16.msra.mxu1 %v4597_v36  ;;  %v4658_v36 = vld [vmem:[#allocation8 + $0x178] ss:$20 sps:$4 sm:$0xff]  }
 0x1fc   :  { %3337 = vmatpush1.bf16.msra.mxu0 %v4600_v41  ;;  %3299 = vmatprep.subr.bf16.mxu1 %v4605_v42  ;;  %v4660_v41 = vld [vmem:[#allocation8 + $0x150] ss:$20 sps:$4 sm:$0xff]  }
 0x1fd   :  { %3338 = vmatprep.subr.bf16.mxu0 %v4608_v10  ;;  %v4661_v42 = vld [vmem:[#allocation8 + $0x10] ss:$20 sps:$4 sm:$0xff]   ;;  %v4662_v10 = vld [vmem:[#allocation8 + $0x628] ss:$20 sps:$4 sm:$0xff]  }
 0x1ff   :  { %3300 = vmatpush2.bf16.msra.mxu1 %v4603_v44  ;;  %v4663_v44 = vld [vmem:[#allocation8 + $0x600] ss:$20 sps:$4 sm:$0xff]  }
 0x200   :  { %3339 = vmatpush1.bf16.msra.mxu0 %v4606_v45  ;;  %3301 = vmatprep.subr.bf16.mxu1 %v4611_v46  ;;  %v4664_v45 = vld [vmem:[#allocation8 + $0x5d8] ss:$20 sps:$4 sm:$0xff]   ;;  %v4665_v46 = vld [vmem:[#allocation8 + $0x5b0] ss:$20 sps:$4 sm:$0xff]  }
 0x201   :  { %4027 = vmatprep.subr.bf16.mxu0 %v4612_v15  ;;  %v4666_v15 = vld [vmem:[#allocation8 + $0x588] ss:$20 sps:$4 sm:$0xff]  }
 0x203   :  { %3302 = vmatpush2.bf16.msra.mxu1 %v4609_v47  ;;  %3357 = vmatmul.mubr.bf16.vlgmr.msra.gmra.mxu0 %v4930_v4  ;;  %v4668_v47 = vld [vmem:[#allocation8 + $0x538] ss:$20 sps:$4 sm:$0xff]  }
 0x204   :  { %4028 = vmatpush3.bf16.msra.mxu0 %v4613_v49  ;;  %3437 = vmatprep.mubr.bf16.mxu0 %v4919_v3  ;;  %v4632_v3 = vld [vmem:[#allocation8 + $0x448] ss:$20 sps:$4 sm:$0xff]   ;;  %v4669_v49 = vld [vmem:[#allocation8 + $0x510] ss:$20 sps:$4 sm:$0xff]  }
 0x205   :  { %3303 = vmatprep.subr.bf16.mxu1 %v4616_v50  ;;  %4029 = vmatprep.subr.bf16.mxu0 %v4617_v51  ;;  %v2052_v50 = vld [vmem:[%s4979_s4] sm:$0x1f]  ;;  %s4788_s4 = smov [#allocation10]  }
 0x206   :  { %v3097_v51 = vrot.slane %v2052_v50, %v1403_v54  ;;  %s3541_s15 = sshll.u32 %s4788_s4, 4  ;;  %s3542_s15 = int_to_ptr.vmem [resolvable:$true] %s3541_s15 }
 0x207   :  { %3304 = vmatpush2.bf16.msra.mxu1 %v4614_v52  ;;  %v3101_v52 = vrot.slane %v2052_v50, %v1407_v56  ;;  %s4750_s16 = scalar_lea.vmem %s3542_s15, 80  ;;  %s4754_s17 = scalar_lea.vmem %s3542_s15, 96 }
 0x208   :  { %4030 = vmatpush3.bf16.msra.mxu0 %v4618_v57  ;;  %3305 = vmatprep.subr.bf16.mxu1 %v4621_v58  ;;  %p4751_p6 = scmp.ne.s32.totalorder %s3542_s15, %s4750_s16  ;;  %p4755_p7 = scmp.lt.s32.totalorder %s3542_s15, %s3542_s15 }
 0x209   :  { %4031 = vmatprep.subr.bf16.mxu0 %v4622_v59  ;;  %p4756_p8 = scmp.lt.s32.totalorder %s4754_s17, %s4750_s16 }
 0x20b   :  { %3306 = vmatpush2.bf16.msra.mxu1 %v4619_v61  ;;  %p4757_p9 = por %p4756_p8, %p4755_p7 }
 0x20c   :  { %4032 = vmatpush3.bf16.msra.mxu0 %v4623_v55  ;;  %3307 = vmatprep.subr.bf16.mxu1 %v4626_v62 }
 0x20d   :  { %4033 = vmatprep.subr.bf16.mxu0 %v4627_v0  ;;  %p4758_p10 = pnand %p4757_p9, %p4751_p6 }
 0x20f   :  { %3308 = vmatpush2.bf16.msra.mxu1 %v4624_v1 }
 0x210   :  { %4034 = vmatpush3.bf16.msra.mxu0 %v4628_v2  ;;  %3309 = vmatprep.subr.bf16.mxu1 %v4631_v6 }
 0x211   :  { %4035 = vmatprep.subr.bf16.mxu0 %v4632_v3 }
 0x213   :  { %3310 = vmatpush2.bf16.msra.mxu1 %v4629_v7 }
 0x214   :  { %4036 = vmatpush3.bf16.msra.mxu0 %v4633_v8  ;;  %3311 = vmatprep.subr.bf16.mxu1 %v4636_v9 }
 0x215   :  { %4037 = vmatprep.subr.bf16.mxu0 %v4637_v11 }
 0x217   :  { %3312 = vmatpush2.bf16.msra.mxu1 %v4634_v12 }
 0x218   :  { %4038 = vmatpush3.bf16.msra.mxu0 %v4638_v13  ;;  %3313 = vmatprep.subr.bf16.mxu1 %v4641_v53 }
 0x219   :  { %4039 = vmatprep.subr.bf16.mxu0 %v4642_v14 }
 0x21b   :  { %3314 = vmatpush2.bf16.msra.mxu1 %v4639_v16  ;;  %v3105_v16 = vrot.slane %v2052_v50, %v1411_v39 }
 0x21c   :  { %4040 = vmatpush3.bf16.msra.mxu0 %v4643_v18  ;;  %4005 = vmatprep.subr.bf16.mxu1 %v4644_v63  ;;  %v3109_v18 = vrot.slane %v2052_v50, %v1415_v40 }
 0x21d   :  { %4041 = vmatprep.subr.bf16.mxu0 %v4646_v19 }
 0x21e   :  { %3316 = vmatmul.mubr.bf16.vlgmr.msra.gmra.mxu1 %v4921_v5 }
 0x21f   :  { %4006 = vmatpush3.bf16.msra.mxu1 %v4645_v21  ;;  %3397 = vmatprep.mubr.bf16.mxu1 %v4904_v60  ;;  %v4655_v60 = vld [vmem:[#allocation8 + $0x88] ss:$20 sps:$4 sm:$0xff]  }
 0x220   :  { %4042 = vmatpush3.bf16.msra.mxu0 %v4647_v22  ;;  %4007 = vmatprep.subr.bf16.mxu1 %v4648_v23 }
 0x221   :  { %v3153_v26 = vpop.f32.mrf.mxu1 }
 0x222   :  { %v3154_v57 = vadd.f32 %v3153_v26, %v3097_v51 }
 0x223   :  { %4008 = vmatpush3.bf16.msra.mxu1 %v4649_v24  ;;  %3438 = vmatmul.mubr.bf16.vlgmr.msra.gmra.mxu0 %v4921_v5  ;;  %v3155_v27 = vpop.f32.mrf.mxu1  ;;  %v4659_v5 = vld [vmem:[#allocation8 + $0x38] ss:$20 sps:$4 sm:$0xff]  }
 0x224   :  { %4009 = vmatprep.subr.bf16.mxu1 %v4650_v25  ;;  %v3156_v59 = vadd.f32 %v3155_v27, %v3101_v52 }
 0x225   :  { %v3157_v29 = vpop.f32.mrf.mxu1 }
 0x227   :  { %4010 = vmatpush3.bf16.msra.mxu1 %v4651_v28  ;;  %v3158_v30 = vpop.f32.mrf.mxu1 }
 0x228   :  { %4011 = vmatprep.subr.bf16.mxu1 %v4652_v20 }
 0x22b   :  { %4012 = vmatpush3.bf16.msra.mxu1 %v4653_v31 }
 0x22c   :  { %4013 = vmatprep.subr.bf16.mxu1 %v4654_v32 }
 0x22f   :  { %4014 = vmatpush3.bf16.msra.mxu1 %v4655_v60 }
 0x230   :  { %4015 = vmatprep.subr.bf16.mxu1 %v4656_v33 }
 0x233   :  { %4016 = vmatpush3.bf16.msra.mxu1 %v4657_v34 }
 0x234   :  { %4017 = vmatprep.subr.bf16.mxu1 %v4658_v36 }
 0x237   :  { %4018 = vmatpush3.bf16.msra.mxu1 %v4659_v5 }
 0x238   :  { %4019 = vmatprep.subr.bf16.mxu1 %v4660_v41  ;;  %v3113_v41 = vrot.slane %v2052_v50, %v1419_v38 }
 0x23b   :  { %4020 = vmatpush3.bf16.msra.mxu1 %v4661_v42 }
 0x23c   :  { %4078 = vmatprep.subr.bf16.mxu1 %v4786_v35 }
 0x23e   :  { %3398 = vmatmul.mubr.bf16.vlgmr.msra.gmra.mxu1 %v4906_v17  ;;  %v4667_v17 = vld [vmem:[#allocation8 + $0x560] ss:$20 sps:$4 sm:$0xff]  }
 0x23f   :  { %4079 = vmatpush3.bf16.msra.mxu1 %v4662_v10  ;;  %4094 = vmatprep.mubr.msk.bf16.mxu1 %vm4787_vm0, %v4786_v35 }
 0x240   :  { %4080 = vmatprep.subr.bf16.mxu1 %v4786_v35 }
 0x243   :  { %4081 = vmatpush3.bf16.msra.mxu1 %v4663_v44 }
 0x244   :  { %4082 = vmatprep.subr.bf16.mxu1 %v4786_v35 }
 0x247   :  { %4083 = vmatpush3.bf16.msra.mxu1 %v4664_v45 }
 0x248   :  { %4084 = vmatprep.subr.bf16.mxu1 %v4786_v35 }
 0x24b   :  { %4085 = vmatpush3.bf16.msra.mxu1 %v4665_v46 }
 0x24c   :  { %4086 = vmatprep.subr.bf16.mxu1 %v4786_v35 }
 0x24f   :  { %4087 = vmatpush3.bf16.msra.mxu1 %v4666_v15 }
 0x250   :  { %4088 = vmatprep.subr.bf16.mxu1 %v4786_v35 }
 0x253   :  { %4089 = vmatpush3.bf16.msra.mxu1 %v4667_v17 }
 0x254   :  { %4090 = vmatprep.subr.bf16.mxu1 %v4786_v35 }
 0x257   :  { %4091 = vmatpush3.bf16.msra.mxu1 %v4668_v47 }
 0x258   :  { %4092 = vmatprep.subr.bf16.mxu1 %v4786_v35 }
 0x25b   :  { %4093 = vmatpush3.bf16.msra.mxu1 %v4669_v49 }
 0x25e   :  { %4095 = vmatmul.mubr.bf16.vlgmr.msra.gmra.mxu1 %v4930_v4 }
 0x263   :  { %v3194_v58 = vpop.f32.mrf.mxu0 }
 0x264   :  { %v3195_v61 = vadd.f32 %v3194_v58, %v3154_v57 }
 0x265   :  { %v3196_v55 = vpop.f32.mrf.mxu0 }
 0x266   :  { %v3197_v62 = vadd.f32 %v3196_v55, %v3156_v59 }
 0x267   :  { %v3198_v35 = vpop.f32.mrf.mxu0 }
 0x269   :  { %v3199_v0 = vpop.f32.mrf.mxu0 }
 0x29e   :  { %v3235_v1 = vpop.f32.mrf.mxu1 }
 0x29f   :  { %v3236_v2 = vadd.f32 %v3235_v1, %v3195_v61 }
 0x2a0   :  { %v3237_v6 = vpop.f32.mrf.mxu1 }
 0x2a1   :  { %v3238_v3 = vadd.f32 %v3237_v6, %v3197_v62 }
 0x2a2   :  { %v3239_v7 = vpop.f32.mrf.mxu1 }
 0x2a3   :  { %v3490_v8 = vcombine.low %v3236_v2, %v3238_v3  ;;  %v3276_v54 = vpop.f32.mrf.mxu0 }
 0x2a4   :  { %v3240_v9 = vpop.f32.mrf.mxu1  ;;  %v3277_v63 = vadd.f32 %v3276_v54, %v3105_v16 }
 0x2a5   :  { %v3278_v4 = vpop.f32.mrf.mxu0  ;;  %v3498_v31 = vrot.slane %v3490_v8, %v4841_v48 }
 0x2a6   :  { %v3279_v21 = vadd.f32 %v3278_v4, %v3109_v18 }
 0x2a7   :  { %v3280_v11 = vpop.f32.mrf.mxu0 }
 0x2a9   :  { %v3281_v12 = vpop.f32.mrf.mxu0 }
 0x2c3   :  { %v3358_v56 = vpop.f32.mrf.mxu0 }
 0x2c5   :  { %v3360_v13 = vpop.f32.mrf.mxu0 }
 0x2c7   :  { %v3362_v53 = vpop.f32.mrf.mxu0 }
 0x2c9   :  { %v3363_v14 = vpop.f32.mrf.mxu0 }
 0x2de   :  { %v3317_v19 = vpop.f32.mrf.mxu1 }
 0x2df   :  { %v3318_v22 = vadd.f32 %v3317_v19, %v3277_v63 }
 0x2e0   :  { %v3319_v23 = vpop.f32.mrf.mxu1 }
 0x2e1   :  { %v3359_v24 = vadd.f32 %v3358_v56, %v3318_v22  ;;  %v3320_v25 = vadd.f32 %v3319_v23, %v3279_v21 }
 0x2e2   :  { %v3321_v26 = vpop.f32.mrf.mxu1 }
 0x2e3   :  { %v3361_v27 = vadd.f32 %v3360_v13, %v3320_v25  ;;  %v4043_v28 = vpop.f32.mrf.mxu0 }
 0x2e4   :  { %v3322_v20 = vpop.f32.mrf.mxu1 }
 0x2e5   :  { %v3491_v29 = vcombine.low %v3359_v24, %v3361_v27  ;;  %v4044_v30 = vpop.f32.mrf.mxu0 }
 0x2e6   :  { %v4045_v44 = vadd.f32 %v4044_v30, %v4043_v28 }
 0x2e7   :  { %v3505_v39 = vrot.slane %v3491_v29, %v4841_v48  ;;  %v4046_v32 = vpop.f32.mrf.mxu0 }
 0x2e9   :  { %v3513_v60 = vcombine.low %v3498_v31, %v3505_v39  ;;  %v4047_v40 = vpop.f32.mrf.mxu0 }
 0x2eb   :  { %v3520_v52 = vrot.slane %v3513_v60, %v4841_v48 }
 0x2fe   :  { %v4021_v33 = vpop.f32.mrf.mxu1 }
 0x300   :  { %v4022_v34 = vpop.f32.mrf.mxu1 }
 0x301   :  { %v4023_v42 = vadd.f32 %v4022_v34, %v4021_v33 }
 0x302   :  { %v4024_v36 = vpop.f32.mrf.mxu1 }
 0x303   :  { %v3400_v10 = vadd.f32 %v4023_v42, %v3113_v41 }
 0x304   :  { %v4025_v5 = vpop.f32.mrf.mxu1 }
 0x305   :  { %v3440_v45 = vadd.f32 %v4045_v44, %v3400_v10 }
 0x31e   :  { %v3479_v46 = vpop.f32.mrf.mxu1 }
 0x31f   :  { %v3480_v15 = vadd.f32 %v3479_v46, %v3440_v45 }
 0x320   :  { %v4096_v17 = vpop.f32.mrf.mxu1 }
 0x321   :  { %v3512_v47 = vrot.slane %v3480_v15, %v4841_v48 }
 0x322   :  { %v3482_v49 = vpop.f32.mrf.mxu1 }
 0x323   :  { %v3527_v51 = vrot.slane %v3512_v47, %v4841_v48 }
 0x324   :  { %v4097_v57 = vpop.f32.mrf.mxu1 }
 0x325   :  { %v3528_v43 = vcombine.low %v3520_v52, %v3527_v51 }
 0x327   :  { %3534 = vst.msk [vmem:[#allocation10] sm:$0x1f] %vm3532_vm6, %v3528_v43 }
 0x328   :  { %4761 = shalt.err (!%p4758_p10)
}
 0x329   :  { %3544 = dma.vmem_to_hbm [thread:$0]  %s3542_s15, 80, %s4980_s5, [#allocation4]  }
 0x32a   :  { %4776 = dma.done.wait [#allocation4], 80  }
 0x32b   :  { %4777 = vsyncadd [#allocation4], 4294967216 }
 0x32c   :  { %3548 = vsyncpa [#allocation3], 1 }
 0x32d   :  { %3549 = vsyncpa [#allocation6], 1 }
 0x32e   :  { %3550 = vsyncpa [#allocation9], 1 }
 0x32f   :  { %3551 = vsyncpa [#allocation4], 1 }

</bundles_post_ra>
